<compile_context>
chip_gen: v7x
topology: tpu7x:2x2x1
jax: 0.10.0
libtpu: 0.0.40
codegen_flags: <defaults>
</compile_context>

<pallas_src>
import functools

import jax
import jax.numpy as jnp
from jax import lax
from jax.experimental import pallas as pl
from jax.experimental.pallas import tpu as pltpu

CPAD = 128      # every channel dimension padded to one 128-lane vreg width
TAPS = 9        # 3x3 conv taps
BN_EPS = 1e-5


def _round_up(x, m):
    return (x + m - 1) // m * m


# ---------------------------------------------------------------------------
# Fused ResBottleneck kernel (one tile of output pixels per grid step)
# ---------------------------------------------------------------------------
def _res_bottleneck_kernel(p_ref, w1_ref, w2_ref, w3_ref, wr_ref, sh_ref, o_ref,
                           *, cpad, taps):
    """p_ref : (TM, taps*cpad) bf16  im2col patches of x (3x3, stride, pad=1) + padding flag
       w1_ref: (cpad, cpad)     bf16  conv1 (1x1) weights, BN1 scale folded, -1e9 flag row
       w2_ref: (taps*cpad,cpad) bf16  conv2 (3x3) per-tap weights, BN2 scale folded
       w3_ref: (cpad, cpad)     bf16  conv3 (1x1) weights, BN3 scale folded
       wr_ref: (cpad, cpad)     bf16  residual 1x1 weights (BN folded) or identity
       sh_ref: (8, cpad)        f32   rows 0..3 = shift1, shift2, shift3, shift_res
       o_ref : (TM, cpad)       f32   block output (lane-dense, unmasked stores)"""
    tm = p_ref.shape[0]
    p = p_ref[...]
    w1 = w1_ref[...]
    shifts = sh_ref[...]
    # Hoist the sublane broadcast out of the tap loop (no CSE of broadcast_in_dim).
    shift1 = jnp.broadcast_to(shifts[0:1, :], (tm, cpad))
    shift2 = shifts[1:2, :]
    shift3 = shifts[2:3, :]
    shiftr = shifts[3:4, :]

    acc2 = jnp.zeros((tm, cpad), jnp.float32)
    for t in range(taps):                                   # statically unrolled
        pt = p[:, t * cpad:(t + 1) * cpad]
        # conv1 + BN1 + ReLU at this tap's input position (padding flag -> exact zero).
        h = jnp.dot(pt, w1, preferred_element_type=jnp.float32) + shift1
        h = jnp.maximum(h, 0.0)
        # conv2 contribution of this tap, BN2 scale already folded into w2.
        acc2 = acc2 + jnp.dot(h.astype(jnp.bfloat16),
                              w2_ref[t * cpad:(t + 1) * cpad, :],
                              preferred_element_type=jnp.float32)

    h2 = jnp.maximum(acc2 + shift2, 0.0)                    # BN2 shift + ReLU
    out3 = jnp.dot(h2.astype(jnp.bfloat16), w3_ref[...],
                   preferred_element_type=jnp.float32) + shift3

    # Residual path: 1x1(stride) conv (or identity matrix) on the CENTER tap of the patches.
    center = p[:, (taps // 2) * cpad:(taps // 2 + 1) * cpad]
    res = jnp.dot(center, wr_ref[...], preferred_element_type=jnp.float32) + shiftr

    o_ref[...] = jnp.maximum(out3 + res, 0.0).astype(o_ref.dtype)


# ---------------------------------------------------------------------------
# Wrapper-side glue: BN folding, weight matrices, im2col (+ padding flag)
# ---------------------------------------------------------------------------
def _fold_bn(bn):
    gamma, beta, rm, rv = bn
    scale = gamma / jnp.sqrt(rv + BN_EPS)
    shift = beta - rm * scale
    return scale, shift


def _weight_matrix_1x1(w_oihw, scale):
    """(O,I,1,1) conv weight -> (CPAD, CPAD) bf16 matrix with BN scale folded in."""
    cout, cin = w_oihw.shape[0], w_oihw.shape[1]
    m = jnp.transpose(w_oihw[:, :, 0, 0], (1, 0)) * scale[None, :]
    m = jnp.pad(m, ((0, CPAD - cin), (0, CPAD - cout)))
    return m.astype(jnp.bfloat16)


def _weight_matrix_3x3(w_oihw, scale):
    """(O,I,3,3) conv weight -> (9*CPAD, CPAD) bf16, per-tap blocks, BN scale folded in."""
    cout, cin, kh, kw = w_oihw.shape
    mats = []
    for di in range(kh):
        for dj in range(kw):
            m = jnp.transpose(w_oihw[:, :, di, dj], (1, 0)) * scale[None, :]
            mats.append(jnp.pad(m, ((0, CPAD - cin), (0, CPAD - cout))))
    return jnp.concatenate(mats, axis=0).astype(jnp.bfloat16)


def _make_patches(x_nhwc, stride):
    """NHWC x -> im2col patches (B*Ho*Wo, 9*CPAD) bf16 for a 3x3/stride/pad=1 conv.

    Per-tap channel layout: [x channels, padding-flag (1 on the zero-padding ring), zeros].
    The flag channel lets the kernel reproduce conv2's spatial zero-padding exactly after
    commuting conv1 through the im2col (its conv1 weight row is -1e9, ReLU -> 0)."""
    B, H, W, C = x_nhwc.shape
    Ho = (H - 1) // stride + 1
    Wo = (W - 1) // stride + 1
    xp = jnp.pad(x_nhwc, ((0, 0), (1, 1), (1, 1), (0, 0)))
    flag = jnp.pad(jnp.zeros((B, H, W, 1), x_nhwc.dtype),
                   ((0, 0), (1, 1), (1, 1), (0, 0)), constant_values=1.0)
    full = jnp.concatenate([xp, flag], axis=-1)
    full = jnp.pad(full, ((0, 0), (0, 0), (0, 0), (0, CPAD - C - 1)))
    # TODO(synk): at large H*W, build these shifted views inside the kernel (VMEM slices /
    # manual DMA) instead of materializing the 9x-expanded im2col tensor in HBM.
    cols = []
    for di in range(3):
        for dj in range(3):
            cols.append(full[:, di:di + stride * Ho:stride,
                             dj:dj + stride * Wo:stride, :])
    patches = jnp.concatenate(cols, axis=-1).reshape(B * Ho * Wo, TAPS * CPAD)
    return patches.astype(jnp.bfloat16), (B, Ho, Wo)


def res_bottleneck_forward(x_nchw, params, scenario=0):
    """Fused Pallas forward of ResBottleneck (inference BN, dropout p=0, ReLU)."""
    stride = params['stride']
    w1, w2, w3 = params['conv1'], params['conv2'], params['conv3']
    planes, in_planes = w1.shape[0], w1.shape[1]
    out_planes = w3.shape[0]
    assert in_planes < CPAD and planes <= CPAD and out_planes <= CPAD, \
        "single-vreg channel tiling only (channels < 128)"

    s1, b1 = _fold_bn(params['ln1'][scenario])
    s2, b2 = _fold_bn(params['ln2'][scenario])
    s3, b3 = _fold_bn(params['ln3'][scenario])

    w1m = _weight_matrix_1x1(w1, s1)
    w1m = w1m.at[in_planes, :].set(-1e9)        # padding-flag row: ReLU kills padded taps
    w2m = _weight_matrix_3x3(w2, s2)
    w3m = _weight_matrix_1x1(w3, s3)

    if params['residual_conv'] is not None:
        sr, br = _fold_bn(params['residual_ln'][scenario])
        wrm = _weight_matrix_1x1(params['residual_conv'], sr)
    else:
        wrm = jnp.eye(CPAD, dtype=jnp.bfloat16)  # identity residual (bit-exact via MXU)
        br = jnp.zeros((out_planes,), jnp.float32)

    shifts = jnp.zeros((8, CPAD), jnp.float32)
    shifts = shifts.at[0, :planes].set(b1)
    shifts = shifts.at[1, :planes].set(b2)
    shifts = shifts.at[2, :out_planes].set(b3)
    shifts = shifts.at[3, :out_planes].set(br)

    # NCHW (PyTorch) -> NHWC, bf16 MXU operands.
    x = jnp.transpose(x_nchw, (0, 2, 3, 1))
    patches, (B, Ho, Wo) = _make_patches(x, stride)

    M = B * Ho * Wo
    M_pad = _round_up(M, 16)
    TM = 128 if M_pad >= 256 else max(8, M_pad // 2)   # >=2 grid steps when possible
    M_pad = _round_up(M_pad, TM)
    patches = jnp.pad(patches, ((0, M_pad - M), (0, 0)))

    kernel = functools.partial(_res_bottleneck_kernel, cpad=CPAD, taps=TAPS)
    out = pl.pallas_call(
        kernel,
        out_shape=jax.ShapeDtypeStruct((M_pad, CPAD), jnp.float32),
        grid=(M_pad // TM,),
        in_specs=[
            pl.BlockSpec((TM, TAPS * CPAD), lambda i: (i, 0)),
            pl.BlockSpec((CPAD, CPAD), lambda i: (0, 0)),
            pl.BlockSpec((TAPS * CPAD, CPAD), lambda i: (0, 0)),
            pl.BlockSpec((CPAD, CPAD), lambda i: (0, 0)),
            pl.BlockSpec((CPAD, CPAD), lambda i: (0, 0)),
            pl.BlockSpec((8, CPAD), lambda i: (0, 0)),
        ],
        out_specs=pl.BlockSpec((TM, CPAD), lambda i: (i, 0)),
        compiler_params=pltpu.CompilerParams(
            dimension_semantics=("parallel",)),
    )(patches, w1m, w2m, w3m, wrm, shifts)

    out = out[:M, :out_planes].reshape(B, Ho, Wo, out_planes)
    return jnp.transpose(out, (0, 3, 1, 2))                 # back to NCHW


# ---------------------------------------------------------------------------
# Parameter init (deterministic, synthetic) mirroring ResBottleneck.__init__
# ---------------------------------------------------------------------------
def init_res_bottleneck_params(key, in_planes, planes=None, out_planes=None,
                               stride=1, scenario_num=1):
    expansion = 4
    if planes is None:
        planes = in_planes // expansion
    if out_planes is None:
        out_planes = planes * expansion

    def conv_w(k, cout, cin, kh, kw):
        std = 1.0 / jnp.sqrt(jnp.float32(cin * kh * kw))
        return jax.random.normal(k, (cout, cin, kh, kw), jnp.float32) * std

    def bn(k, c):
        k1, k2, k3, k4 = jax.random.split(k, 4)
        return (0.5 + jax.random.uniform(k1, (c,), jnp.float32),   # gamma
                0.1 * jax.random.normal(k2, (c,), jnp.float32),    # beta
                0.1 * jax.random.normal(k3, (c,), jnp.float32),    # running_mean
                0.5 + jax.random.uniform(k4, (c,), jnp.float32))   # running_var

    keys = jax.random.split(key, 8)
    params = {
        'stride': stride,
        'conv1': conv_w(keys[0], planes, in_planes, 1, 1),
        'ln1': [bn(jax.random.fold_in(keys[1], s), planes) for s in range(scenario_num)],
        'conv2': conv_w(keys[2], planes, planes, 3, 3),
        'ln2': [bn(jax.random.fold_in(keys[3], s), planes) for s in range(scenario_num)],
        'conv3': conv_w(keys[4], out_planes, planes, 1, 1),
        'ln3': [bn(jax.random.fold_in(keys[5], s), out_planes) for s in range(scenario_num)],
        'residual_conv': None,
        'residual_ln': None,
    }
    if stride != 1 or in_planes != out_planes:
        params['residual_conv'] = conv_w(keys[6], out_planes, in_planes, 1, 1)
        params['residual_ln'] = [bn(jax.random.fold_in(keys[7], s), out_planes)
                                 for s in range(scenario_num)]
    return params


# ---------------------------------------------------------------------------
# Pure-JAX reference (same numerics contract: bf16 operands, f32 accumulation)
# ---------------------------------------------------------------------------
def _conv_ref(x_bf16, w_oihw_folded, stride, pad):
    w = jnp.transpose(w_oihw_folded, (2, 3, 1, 0)).astype(jnp.bfloat16)   # HWIO
    return lax.conv_general_dilated(
        x_bf16, w, window_strides=(stride, stride),
        padding=[(pad, pad), (pad, pad)],
        dimension_numbers=('NHWC', 'HWIO', 'NHWC'),
        preferred_element_type=jnp.float32)


def res_bottleneck_reference(x_nchw, params, scenario=0):
    stride = params['stride']
    s1, b1 = _fold_bn(params['ln1'][scenario])
    s2, b2 = _fold_bn(params['ln2'][scenario])
    s3, b3 = _fold_bn(params['ln3'][scenario])
    w1f = params['conv1'] * s1[:, None, None, None]
    w2f = params['conv2'] * s2[:, None, None, None]
    w3f = params['conv3'] * s3[:, None, None, None]

    x = jnp.transpose(x_nchw, (0, 2, 3, 1)).astype(jnp.bfloat16)
    h1 = jnp.maximum(_conv_ref(x, w1f, 1, 0) + b1, 0.0)
    h2 = jnp.maximum(_conv_ref(h1.astype(jnp.bfloat16), w2f, stride, 1) + b2, 0.0)
    out3 = _conv_ref(h2.astype(jnp.bfloat16), w3f, 1, 0) + b3
    if params['residual_conv'] is not None:
        sr, br = _fold_bn(params['residual_ln'][scenario])
        wrf = params['residual_conv'] * sr[:, None, None, None]
        identity = _conv_ref(x, wrf, stride, 0) + br
    else:
        identity = x.astype(jnp.float32)
    out = jnp.maximum(out3 + identity, 0.0)
    return jnp.transpose(out, (0, 3, 1, 2))


# ---------------------------------------------------------------------------
if __name__ == "__main__":
    key = jax.random.PRNGKey(0)
    kx, kp1, kp2 = jax.random.split(key, 3)

    # Small NCHW input consistent with the module: batch=2, in_planes=16, 16x16 spatial.
    x = jax.random.normal(kx, (2, 16, 16, 16), jnp.float32)

    # Case A: stride=1, in_planes == out_planes -> identity residual (2 scenarios).
    pA = init_res_bottleneck_params(kp1, in_planes=16, stride=1, scenario_num=2)
    outA = jax.block_until_ready(
        jax.jit(lambda a: res_bottleneck_forward(a, pA, scenario=1))(x))
    refA = jax.block_until_ready(res_bottleneck_reference(x, pA, scenario=1))
    assert outA.shape == (2, 16, 16, 16), outA.shape
    assert jnp.allclose(outA, refA, atol=2e-2, rtol=2e-2), \
        float(jnp.max(jnp.abs(outA - refA)))

    # Case B: stride=2 -> downsampling block with a 1x1 residual conv.
    pB = init_res_bottleneck_params(kp2, in_planes=16, stride=2, scenario_num=1)
    outB = jax.block_until_ready(
        jax.jit(lambda a: res_bottleneck_forward(a, pB, scenario=0))(x))
    refB = jax.block_until_ready(res_bottleneck_reference(x, pB, scenario=0))
    assert outB.shape == (2, 16, 8, 8), outB.shape
    assert jnp.allclose(outB, refB, atol=2e-2, rtol=2e-2), \
        float(jnp.max(jnp.abs(outB - refB)))

    print("KERNEL_OK")
</pallas_src>

<mosaic_0001>
module attributes {stable_mosaic.version = 11 : i64} {
  func.func @_res_bottleneck_kernel(%arg0: i32, %arg1: memref<128x1152xbf16, #tpu.memory_space<vmem>>, %arg2: memref<128x128xbf16, #tpu.memory_space<vmem>>, %arg3: memref<1152x128xbf16, #tpu.memory_space<vmem>>, %arg4: memref<128x128xbf16, #tpu.memory_space<vmem>>, %arg5: memref<128x128xbf16, #tpu.memory_space<vmem>>, %arg6: memref<8x128xf32, #tpu.memory_space<vmem>>, %arg7: memref<128x128xf32, #tpu.memory_space<vmem>>) attributes {dimension_semantics = [#tpu.dimension_semantics<parallel>], iteration_bounds = array<i64: 4>, scalar_prefetch = 0 : i64, scratch_operands = 0 : i64, tpu.core_type = #tpu.core_type<tc>, window_params = [{transform_indices = @transform_0, window_bounds = array<i64: 128, 1152>}, {pipeline_mode = #tpu.pipeline_mode<synchronous>, transform_indices = @transform_1, window_bounds = array<i64: 128, 128>}, {pipeline_mode = #tpu.pipeline_mode<synchronous>, transform_indices = @transform_2, window_bounds = array<i64: 1152, 128>}, {pipeline_mode = #tpu.pipeline_mode<synchronous>, transform_indices = @transform_3, window_bounds = array<i64: 128, 128>}, {pipeline_mode = #tpu.pipeline_mode<synchronous>, transform_indices = @transform_4, window_bounds = array<i64: 128, 128>}, {pipeline_mode = #tpu.pipeline_mode<synchronous>, transform_indices = @transform_5, window_bounds = array<i64: 8, 128>}, {transform_indices = @transform_6, window_bounds = array<i64: 128, 128>}]} {
    %c0 = arith.constant 0 : index
    %c0_0 = arith.constant 0 : index
    %0 = vector.load %arg1[%c0, %c0_0] : memref<128x1152xbf16, #tpu.memory_space<vmem>>, vector<128x1152xbf16>
    %c0_1 = arith.constant 0 : index
    %c0_2 = arith.constant 0 : index
    %1 = vector.load %arg2[%c0_1, %c0_2] : memref<128x128xbf16, #tpu.memory_space<vmem>>, vector<128x128xbf16>
    %c0_3 = arith.constant 0 : index
    %c0_4 = arith.constant 0 : index
    %2 = vector.load %arg6[%c0_3, %c0_4] : memref<8x128xf32, #tpu.memory_space<vmem>>, vector<8x128xf32>
    %3 = vector.extract_strided_slice %2 {offsets = [0, 0], sizes = [1, 128], strides = [1, 1]} : vector<8x128xf32> to vector<1x128xf32>
    %4 = vector.shape_cast %3 : vector<1x128xf32> to vector<1x128xf32>
    %5 = vector.broadcast %4 : vector<1x128xf32> to vector<128x128xf32>
    %6 = vector.extract_strided_slice %2 {offsets = [1, 0], sizes = [1, 128], strides = [1, 1]} : vector<8x128xf32> to vector<1x128xf32>
    %7 = vector.extract_strided_slice %2 {offsets = [2, 0], sizes = [1, 128], strides = [1, 1]} : vector<8x128xf32> to vector<1x128xf32>
    %8 = vector.extract_strided_slice %2 {offsets = [3, 0], sizes = [1, 128], strides = [1, 1]} : vector<8x128xf32> to vector<1x128xf32>
    %cst = arith.constant 0.000000e+00 : f32
    %9 = vector.broadcast %cst : f32 to vector<128x128xf32>
    %10 = vector.extract_strided_slice %0 {offsets = [0, 0], sizes = [128, 128], strides = [1, 1]} : vector<128x1152xbf16> to vector<128x128xbf16>
    %cst_5 = arith.constant dense<0.000000e+00> : vector<128x128xf32>
    %11 = tpu.matmul %10, %1, %cst_5 {dimension_numbers = #tpu.dot_dimension_numbers<[1], [0], [0], [1], [0, 0, 1, 1], [], []>} : vector<128x128xbf16>, vector<128x128xbf16>, vector<128x128xf32> -> vector<128x128xf32>
    %12 = arith.addf %11, %5 : vector<128x128xf32>
    %cst_6 = arith.constant 0.000000e+00 : f32
    %13 = vector.broadcast %cst_6 : f32 to vector<128x128xf32>
    %14 = arith.maximumf %12, %13 : vector<128x128xf32>
    %15 = arith.truncf %14 : vector<128x128xf32> to vector<128x128xbf16>
    %c0_7 = arith.constant 0 : index
    %c0_8 = arith.constant 0 : index
    %16 = vector.load %arg3[%c0_7, %c0_8] : memref<1152x128xbf16, #tpu.memory_space<vmem>>, vector<128x128xbf16>
    %cst_9 = arith.constant dense<0.000000e+00> : vector<128x128xf32>
    %17 = tpu.matmul %15, %16, %cst_9 {dimension_numbers = #tpu.dot_dimension_numbers<[1], [0], [0], [1], [0, 0, 1, 1], [], []>} : vector<128x128xbf16>, vector<128x128xbf16>, vector<128x128xf32> -> vector<128x128xf32>
    %18 = arith.addf %9, %17 : vector<128x128xf32>
    %19 = vector.extract_strided_slice %0 {offsets = [0, 128], sizes = [128, 128], strides = [1, 1]} : vector<128x1152xbf16> to vector<128x128xbf16>
    %cst_10 = arith.constant dense<0.000000e+00> : vector<128x128xf32>
    %20 = tpu.matmul %19, %1, %cst_10 {dimension_numbers = #tpu.dot_dimension_numbers<[1], [0], [0], [1], [0, 0, 1, 1], [], []>} : vector<128x128xbf16>, vector<128x128xbf16>, vector<128x128xf32> -> vector<128x128xf32>
    %21 = arith.addf %20, %5 : vector<128x128xf32>
    %cst_11 = arith.constant 0.000000e+00 : f32
    %22 = vector.broadcast %cst_11 : f32 to vector<128x128xf32>
    %23 = arith.maximumf %21, %22 : vector<128x128xf32>
    %24 = arith.truncf %23 : vector<128x128xf32> to vector<128x128xbf16>
    %c128 = arith.constant 128 : index
    %c0_12 = arith.constant 0 : index
    %25 = vector.load %arg3[%c128, %c0_12] : memref<1152x128xbf16, #tpu.memory_space<vmem>>, vector<128x128xbf16>
    %cst_13 = arith.constant dense<0.000000e+00> : vector<128x128xf32>
    %26 = tpu.matmul %24, %25, %cst_13 {dimension_numbers = #tpu.dot_dimension_numbers<[1], [0], [0], [1], [0, 0, 1, 1], [], []>} : vector<128x128xbf16>, vector<128x128xbf16>, vector<128x128xf32> -> vector<128x128xf32>
    %27 = arith.addf %18, %26 : vector<128x128xf32>
    %28 = vector.extract_strided_slice %0 {offsets = [0, 256], sizes = [128, 128], strides = [1, 1]} : vector<128x1152xbf16> to vector<128x128xbf16>
    %cst_14 = arith.constant dense<0.000000e+00> : vector<128x128xf32>
    %29 = tpu.matmul %28, %1, %cst_14 {dimension_numbers = #tpu.dot_dimension_numbers<[1], [0], [0], [1], [0, 0, 1, 1], [], []>} : vector<128x128xbf16>, vector<128x128xbf16>, vector<128x128xf32> -> vector<128x128xf32>
    %30 = arith.addf %29, %5 : vector<128x128xf32>
    %cst_15 = arith.constant 0.000000e+00 : f32
    %31 = vector.broadcast %cst_15 : f32 to vector<128x128xf32>
    %32 = arith.maximumf %30, %31 : vector<128x128xf32>
    %33 = arith.truncf %32 : vector<128x128xf32> to vector<128x128xbf16>
    %c256 = arith.constant 256 : index
    %c0_16 = arith.constant 0 : index
    %34 = vector.load %arg3[%c256, %c0_16] : memref<1152x128xbf16, #tpu.memory_space<vmem>>, vector<128x128xbf16>
    %cst_17 = arith.constant dense<0.000000e+00> : vector<128x128xf32>
    %35 = tpu.matmul %33, %34, %cst_17 {dimension_numbers = #tpu.dot_dimension_numbers<[1], [0], [0], [1], [0, 0, 1, 1], [], []>} : vector<128x128xbf16>, vector<128x128xbf16>, vector<128x128xf32> -> vector<128x128xf32>
    %36 = arith.addf %27, %35 : vector<128x128xf32>
    %37 = vector.extract_strided_slice %0 {offsets = [0, 384], sizes = [128, 128], strides = [1, 1]} : vector<128x1152xbf16> to vector<128x128xbf16>
    %cst_18 = arith.constant dense<0.000000e+00> : vector<128x128xf32>
    %38 = tpu.matmul %37, %1, %cst_18 {dimension_numbers = #tpu.dot_dimension_numbers<[1], [0], [0], [1], [0, 0, 1, 1], [], []>} : vector<128x128xbf16>, vector<128x128xbf16>, vector<128x128xf32> -> vector<128x128xf32>
    %39 = arith.addf %38, %5 : vector<128x128xf32>
    %cst_19 = arith.constant 0.000000e+00 : f32
    %40 = vector.broadcast %cst_19 : f32 to vector<128x128xf32>
    %41 = arith.maximumf %39, %40 : vector<128x128xf32>
    %42 = arith.truncf %41 : vector<128x128xf32> to vector<128x128xbf16>
    %c384 = arith.constant 384 : index
    %c0_20 = arith.constant 0 : index
    %43 = vector.load %arg3[%c384, %c0_20] : memref<1152x128xbf16, #tpu.memory_space<vmem>>, vector<128x128xbf16>
    %cst_21 = arith.constant dense<0.000000e+00> : vector<128x128xf32>
    %44 = tpu.matmul %42, %43, %cst_21 {dimension_numbers = #tpu.dot_dimension_numbers<[1], [0], [0], [1], [0, 0, 1, 1], [], []>} : vector<128x128xbf16>, vector<128x128xbf16>, vector<128x128xf32> -> vector<128x128xf32>
    %45 = arith.addf %36, %44 : vector<128x128xf32>
    %46 = vector.extract_strided_slice %0 {offsets = [0, 512], sizes = [128, 128], strides = [1, 1]} : vector<128x1152xbf16> to vector<128x128xbf16>
    %cst_22 = arith.constant dense<0.000000e+00> : vector<128x128xf32>
    %47 = tpu.matmul %46, %1, %cst_22 {dimension_numbers = #tpu.dot_dimension_numbers<[1], [0], [0], [1], [0, 0, 1, 1], [], []>} : vector<128x128xbf16>, vector<128x128xbf16>, vector<128x128xf32> -> vector<128x128xf32>
    %48 = arith.addf %47, %5 : vector<128x128xf32>
    %cst_23 = arith.constant 0.000000e+00 : f32
    %49 = vector.broadcast %cst_23 : f32 to vector<128x128xf32>
    %50 = arith.maximumf %48, %49 : vector<128x128xf32>
    %51 = arith.truncf %50 : vector<128x128xf32> to vector<128x128xbf16>
    %c512 = arith.constant 512 : index
    %c0_24 = arith.constant 0 : index
    %52 = vector.load %arg3[%c512, %c0_24] : memref<1152x128xbf16, #tpu.memory_space<vmem>>, vector<128x128xbf16>
    %cst_25 = arith.constant dense<0.000000e+00> : vector<128x128xf32>
    %53 = tpu.matmul %51, %52, %cst_25 {dimension_numbers = #tpu.dot_dimension_numbers<[1], [0], [0], [1], [0, 0, 1, 1], [], []>} : vector<128x128xbf16>, vector<128x128xbf16>, vector<128x128xf32> -> vector<128x128xf32>
    %54 = arith.addf %45, %53 : vector<128x128xf32>
    %55 = vector.extract_strided_slice %0 {offsets = [0, 640], sizes = [128, 128], strides = [1, 1]} : vector<128x1152xbf16> to vector<128x128xbf16>
    %cst_26 = arith.constant dense<0.000000e+00> : vector<128x128xf32>
    %56 = tpu.matmul %55, %1, %cst_26 {dimension_numbers = #tpu.dot_dimension_numbers<[1], [0], [0], [1], [0, 0, 1, 1], [], []>} : vector<128x128xbf16>, vector<128x128xbf16>, vector<128x128xf32> -> vector<128x128xf32>
    %57 = arith.addf %56, %5 : vector<128x128xf32>
    %cst_27 = arith.constant 0.000000e+00 : f32
    %58 = vector.broadcast %cst_27 : f32 to vector<128x128xf32>
    %59 = arith.maximumf %57, %58 : vector<128x128xf32>
    %60 = arith.truncf %59 : vector<128x128xf32> to vector<128x128xbf16>
    %c640 = arith.constant 640 : index
    %c0_28 = arith.constant 0 : index
    %61 = vector.load %arg3[%c640, %c0_28] : memref<1152x128xbf16, #tpu.memory_space<vmem>>, vector<128x128xbf16>
    %cst_29 = arith.constant dense<0.000000e+00> : vector<128x128xf32>
    %62 = tpu.matmul %60, %61, %cst_29 {dimension_numbers = #tpu.dot_dimension_numbers<[1], [0], [0], [1], [0, 0, 1, 1], [], []>} : vector<128x128xbf16>, vector<128x128xbf16>, vector<128x128xf32> -> vector<128x128xf32>
    %63 = arith.addf %54, %62 : vector<128x128xf32>
    %64 = vector.extract_strided_slice %0 {offsets = [0, 768], sizes = [128, 128], strides = [1, 1]} : vector<128x1152xbf16> to vector<128x128xbf16>
    %cst_30 = arith.constant dense<0.000000e+00> : vector<128x128xf32>
    %65 = tpu.matmul %64, %1, %cst_30 {dimension_numbers = #tpu.dot_dimension_numbers<[1], [0], [0], [1], [0, 0, 1, 1], [], []>} : vector<128x128xbf16>, vector<128x128xbf16>, vector<128x128xf32> -> vector<128x128xf32>
    %66 = arith.addf %65, %5 : vector<128x128xf32>
    %cst_31 = arith.constant 0.000000e+00 : f32
    %67 = vector.broadcast %cst_31 : f32 to vector<128x128xf32>
    %68 = arith.maximumf %66, %67 : vector<128x128xf32>
    %69 = arith.truncf %68 : vector<128x128xf32> to vector<128x128xbf16>
    %c768 = arith.constant 768 : index
    %c0_32 = arith.constant 0 : index
    %70 = vector.load %arg3[%c768, %c0_32] : memref<1152x128xbf16, #tpu.memory_space<vmem>>, vector<128x128xbf16>
    %cst_33 = arith.constant dense<0.000000e+00> : vector<128x128xf32>
    %71 = tpu.matmul %69, %70, %cst_33 {dimension_numbers = #tpu.dot_dimension_numbers<[1], [0], [0], [1], [0, 0, 1, 1], [], []>} : vector<128x128xbf16>, vector<128x128xbf16>, vector<128x128xf32> -> vector<128x128xf32>
    %72 = arith.addf %63, %71 : vector<128x128xf32>
    %73 = vector.extract_strided_slice %0 {offsets = [0, 896], sizes = [128, 128], strides = [1, 1]} : vector<128x1152xbf16> to vector<128x128xbf16>
    %cst_34 = arith.constant dense<0.000000e+00> : vector<128x128xf32>
    %74 = tpu.matmul %73, %1, %cst_34 {dimension_numbers = #tpu.dot_dimension_numbers<[1], [0], [0], [1], [0, 0, 1, 1], [], []>} : vector<128x128xbf16>, vector<128x128xbf16>, vector<128x128xf32> -> vector<128x128xf32>
    %75 = arith.addf %74, %5 : vector<128x128xf32>
    %cst_35 = arith.constant 0.000000e+00 : f32
    %76 = vector.broadcast %cst_35 : f32 to vector<128x128xf32>
    %77 = arith.maximumf %75, %76 : vector<128x128xf32>
    %78 = arith.truncf %77 : vector<128x128xf32> to vector<128x128xbf16>
    %c896 = arith.constant 896 : index
    %c0_36 = arith.constant 0 : index
    %79 = vector.load %arg3[%c896, %c0_36] : memref<1152x128xbf16, #tpu.memory_space<vmem>>, vector<128x128xbf16>
    %cst_37 = arith.constant dense<0.000000e+00> : vector<128x128xf32>
    %80 = tpu.matmul %78, %79, %cst_37 {dimension_numbers = #tpu.dot_dimension_numbers<[1], [0], [0], [1], [0, 0, 1, 1], [], []>} : vector<128x128xbf16>, vector<128x128xbf16>, vector<128x128xf32> -> vector<128x128xf32>
    %81 = arith.addf %72, %80 : vector<128x128xf32>
    %82 = vector.extract_strided_slice %0 {offsets = [0, 1024], sizes = [128, 128], strides = [1, 1]} : vector<128x1152xbf16> to vector<128x128xbf16>
    %cst_38 = arith.constant dense<0.000000e+00> : vector<128x128xf32>
    %83 = tpu.matmul %82, %1, %cst_38 {dimension_numbers = #tpu.dot_dimension_numbers<[1], [0], [0], [1], [0, 0, 1, 1], [], []>} : vector<128x128xbf16>, vector<128x128xbf16>, vector<128x128xf32> -> vector<128x128xf32>
    %84 = arith.addf %83, %5 : vector<128x128xf32>
    %cst_39 = arith.constant 0.000000e+00 : f32
    %85 = vector.broadcast %cst_39 : f32 to vector<128x128xf32>
    %86 = arith.maximumf %84, %85 : vector<128x128xf32>
    %87 = arith.truncf %86 : vector<128x128xf32> to vector<128x128xbf16>
    %c1024 = arith.constant 1024 : index
    %c0_40 = arith.constant 0 : index
    %88 = vector.load %arg3[%c1024, %c0_40] : memref<1152x128xbf16, #tpu.memory_space<vmem>>, vector<128x128xbf16>
    %cst_41 = arith.constant dense<0.000000e+00> : vector<128x128xf32>
    %89 = tpu.matmul %87, %88, %cst_41 {dimension_numbers = #tpu.dot_dimension_numbers<[1], [0], [0], [1], [0, 0, 1, 1], [], []>} : vector<128x128xbf16>, vector<128x128xbf16>, vector<128x128xf32> -> vector<128x128xf32>
    %90 = arith.addf %81, %89 : vector<128x128xf32>
    %91 = vector.broadcast %6 : vector<1x128xf32> to vector<128x128xf32>
    %92 = arith.addf %90, %91 : vector<128x128xf32>
    %cst_42 = arith.constant 0.000000e+00 : f32
    %93 = vector.broadcast %cst_42 : f32 to vector<128x128xf32>
    %94 = arith.maximumf %92, %93 : vector<128x128xf32>
    %95 = arith.truncf %94 : vector<128x128xf32> to vector<128x128xbf16>
    %c0_43 = arith.constant 0 : index
    %c0_44 = arith.constant 0 : index
    %96 = vector.load %arg4[%c0_43, %c0_44] : memref<128x128xbf16, #tpu.memory_space<vmem>>, vector<128x128xbf16>
    %cst_45 = arith.constant dense<0.000000e+00> : vector<128x128xf32>
    %97 = tpu.matmul %95, %96, %cst_45 {dimension_numbers = #tpu.dot_dimension_numbers<[1], [0], [0], [1], [0, 0, 1, 1], [], []>} : vector<128x128xbf16>, vector<128x128xbf16>, vector<128x128xf32> -> vector<128x128xf32>
    %98 = vector.broadcast %7 : vector<1x128xf32> to vector<128x128xf32>
    %99 = arith.addf %97, %98 : vector<128x128xf32>
    %100 = vector.extract_strided_slice %0 {offsets = [0, 512], sizes = [128, 128], strides = [1, 1]} : vector<128x1152xbf16> to vector<128x128xbf16>
    %c0_46 = arith.constant 0 : index
    %c0_47 = arith.constant 0 : index
    %101 = vector.load %arg5[%c0_46, %c0_47] : memref<128x128xbf16, #tpu.memory_space<vmem>>, vector<128x128xbf16>
    %cst_48 = arith.constant dense<0.000000e+00> : vector<128x128xf32>
    %102 = tpu.matmul %100, %101, %cst_48 {dimension_numbers = #tpu.dot_dimension_numbers<[1], [0], [0], [1], [0, 0, 1, 1], [], []>} : vector<128x128xbf16>, vector<128x128xbf16>, vector<128x128xf32> -> vector<128x128xf32>
    %103 = vector.broadcast %8 : vector<1x128xf32> to vector<128x128xf32>
    %104 = arith.addf %102, %103 : vector<128x128xf32>
    %105 = arith.addf %99, %104 : vector<128x128xf32>
    %cst_49 = arith.constant 0.000000e+00 : f32
    %106 = vector.broadcast %cst_49 : f32 to vector<128x128xf32>
    %107 = arith.maximumf %105, %106 : vector<128x128xf32>
    %c0_50 = arith.constant 0 : index
    %c0_51 = arith.constant 0 : index
    %108 = vector.load %arg7[%c0_50, %c0_51] : memref<128x128xf32, #tpu.memory_space<vmem>>, vector<128x128xf32>
    tpu.vector_store %arg7[%c0_50, %c0_51], %107 {strides = array<i32>} : memref<128x128xf32, #tpu.memory_space<vmem>>, vector<128x128xf32>,
    return
  }
  func.func @transform_0(%arg0: i32) -> (i32, i32) {
    %c0_i32 = arith.constant 0 : i32
    %c0_i32_0 = arith.constant 0 : i32
    return %arg0, %c0_i32 : i32, i32
  }
  func.func @transform_1(%arg0: i32) -> (i32, i32) {
    %c0_i32 = arith.constant 0 : i32
    %c0_i32_0 = arith.constant 0 : i32
    %c0_i32_1 = arith.constant 0 : i32
    return %c0_i32, %c0_i32_0 : i32, i32
  }
  func.func @transform_2(%arg0: i32) -> (i32, i32) {
    %c0_i32 = arith.constant 0 : i32
    %c0_i32_0 = arith.constant 0 : i32
    %c0_i32_1 = arith.constant 0 : i32
    return %c0_i32, %c0_i32_0 : i32, i32
  }
  func.func @transform_3(%arg0: i32) -> (i32, i32) {
    %c0_i32 = arith.constant 0 : i32
    %c0_i32_0 = arith.constant 0 : i32
    %c0_i32_1 = arith.constant 0 : i32
    return %c0_i32, %c0_i32_0 : i32, i32
  }
  func.func @transform_4(%arg0: i32) -> (i32, i32) {
    %c0_i32 = arith.constant 0 : i32
    %c0_i32_0 = arith.constant 0 : i32
    %c0_i32_1 = arith.constant 0 : i32
    return %c0_i32, %c0_i32_0 : i32, i32
  }
  func.func @transform_5(%arg0: i32) -> (i32, i32) {
    %c0_i32 = arith.constant 0 : i32
    %c0_i32_0 = arith.constant 0 : i32
    %c0_i32_1 = arith.constant 0 : i32
    return %c0_i32, %c0_i32_0 : i32, i32
  }
  func.func @transform_6(%arg0: i32) -> (i32, i32) {
    %c0_i32 = arith.constant 0 : i32
    %c0_i32_0 = arith.constant 0 : i32
    return %arg0, %c0_i32 : i32, i32
  }
}

</mosaic_0001>

<bundles_post_ra>
// kernel: _lambda_.1
= control target key start
LH: loop header
LB: loop body
LE: loop exit
PB: predicated region body
PF: predicated region fallthrough
CT: control target
= control target key end

     0   :  { %s5488_s21 = smov 0   ;;  %s6418_s0 = inlined_call_operand.vmem [shape: bf16[512,1152], index: 0, kind: input, shape index: {}]   ;;  %s6419_s1 = inlined_call_operand.vmem [shape: bf16[128,128], index: 1, kind: input, shape index: {}]   ;;  %s6420_s2 = inlined_call_operand.vmem [shape: bf16[1152,128], index: 2, kind: input, shape index: {}]   ;;  %s6421_s3 = inlined_call_operand.vmem [shape: bf16[128,128], index: 3, kind: input, shape index: {}]   ;;  %s6422_s4 = inlined_call_operand.vmem [shape: bf16[128,128], index: 4, kind: input, shape index: {}]   ;;  %s6423_s5 = inlined_call_operand.vmem [shape: f32[8,128], index: 5, kind: input, shape index: {}]   ;;  %s6424_s6 = inlined_call_operand.vmem [shape: f32[512,128], index: 6, kind: output, shape index: {}]  }
   0x1 LB: > { %s3904_s22 = sadd.s32 4294967295, %s5451_s21   ;;  %p3908_p0 = scmp.ge.s32.totalorder %s5451_s21, 1  ;;  %s5451_s21 = sphi %s5488_s21, %s16_s21  }
   0x2   : > { %p214_p1 = scmp.lt.s32.totalorder %s5451_s21, 5 }
   0x4   : > { %p215_p2 = pnand %p3908_p0, %p214_p1 }
   0x5   : > { %v5499_v0 = vld [vmem:[%s6419_s1] sm:$0xff] (!%p215_p2)   ;;  %s3909_s25 = sshll.u32 (!%p215_p2), %s3904_s22, 4  ;;  %v5504_v1 = vld [vmem:[%s6419_s1 + $0x8] sm:$0xff] (!%p215_p2)   ;;  %v5516_v2 = vld [vmem:[%s6419_s1 + $0x10] sm:$0xff] (!%p215_p2)  }
   0x6   : > { %218 = sbr.rel (%p215_p2) target bundleno = 1014 (0x3f6), region = 44  ;;  %p246_p3 = scmp.lt.s32.totalorder (!%p215_p2), %s3909_s25, 63  ;;  %4435 = vmatprep.subr.bf16.mxu1 (!%p215_p2), %v5499_v0  ;;  %4403 = vmatprep.subr.bf16.mxu0 (!%p215_p2), %v5499_v0  ;;  %v5524_v3 = vld [vmem:[%s6419_s1 + $0x18] sm:$0xff] (!%p215_p2)   ;;  %v5541_v5 = vld [vmem:[%s6419_s1 + $0x20] sm:$0xff] (!%p215_p2)   ;;  %v5550_v6 = vld [vmem:[%s6419_s1 + $0x28] sm:$0xff] (!%p215_p2)  }
   0x7   : > { %4436 = vmatpush3.bf16.msra.mxu1 (!%p215_p2), %v5499_v0  ;;  %4404 = vmatpush3.bf16.msra.mxu0 (!%p215_p2), %v5499_v0  ;;  %v5560_v8 = vld [vmem:[%s6419_s1 + $0x30] sm:$0xff] (!%p215_p2)   ;;  %v5569_v9 = vld [vmem:[%s6419_s1 + $0x38] sm:$0xff] (!%p215_p2)   ;;  %v5310_v27 = vld [vmem:[%s6420_s2 + $0x40] sm:$0xff] (!%p215_p2)  }
   0x8   : > { %4437 = vmatprep.subr.bf16.mxu1 (!%p215_p2), %v5504_v1  ;;  %4405 = vmatprep.subr.bf16.mxu0 (!%p215_p2), %v5504_v1  ;;  %v5313_v28 = vld [vmem:[%s6420_s2 + $0x48] sm:$0xff] (!%p215_p2)   ;;  %v5316_v31 = vld [vmem:[%s6420_s2 + $0x50] sm:$0xff] (!%p215_p2)   ;;  %v5319_v32 = vld [vmem:[%s6420_s2 + $0x58] sm:$0xff] (!%p215_p2)  }
   0x9   : > { %v5322_v35 = vld [vmem:[%s6420_s2 + $0x60] sm:$0xff] (!%p215_p2)   ;;  %v5325_v36 = vld [vmem:[%s6420_s2 + $0x68] sm:$0xff] (!%p215_p2)   ;;  %v5328_v46 = vld [vmem:[%s6420_s2 + $0x70] sm:$0xff] (!%p215_p2)  }
   0xa   : > { %v5331_v48 = vld [vmem:[%s6420_s2 + $0x78] sm:$0xff] (!%p215_p2)   ;;  %v5684_v50 = vld [vmem:[%s6420_s2] sm:$0xff] (!%p215_p2)  }
   0xb   : > { %4438 = vmatpush3.bf16.msra.mxu1 (!%p215_p2), %v5504_v1  ;;  %4406 = vmatpush3.bf16.msra.mxu0 (!%p215_p2), %v5504_v1 }
   0xc   : > { %4439 = vmatprep.subr.bf16.mxu1 (!%p215_p2), %v5516_v2  ;;  %4407 = vmatprep.subr.bf16.mxu0 (!%p215_p2), %v5516_v2 }
   0xd   : > { %s6426_s25 = smov (!%p246_p3, %s3909_s25), 63 }
   0xe   : > { %s5219_s30 = smul.u32 36, %s6426_s25  ;;  %s3912_s29 = sshll.u32 %s6426_s25, 3 }
   0xf   : > { %4440 = vmatpush3.bf16.msra.mxu1 %v5516_v2  ;;  %4408 = vmatpush3.bf16.msra.mxu0 %v5516_v2  ;;  %s6397_s8 = scalar_lea.vmem %s6424_s6, %s3912_s29 }
  0x10   : > { %s5529_s11 = scalar_lea.vmem %s6418_s0, %s5219_s30  ;;  %4441 = vmatprep.subr.bf16.mxu1 %v5524_v3  ;;  %4409 = vmatprep.subr.bf16.mxu0 %v5524_v3 }
  0x11   : > { %v5236_v4 = vld [vmem:[%s5529_s11 + $0x4] ss:$36 sps:$4 sm:$0xff]   ;;  %v5238_v10 = vld [vmem:[%s5529_s11 + $0x4c] ss:$36 sps:$4 sm:$0xff]   ;;  %v5240_v12 = vld [vmem:[%s5529_s11 + $0x94] ss:$36 sps:$4 sm:$0xff]  }
  0x12   : > { %4451 = vmatprep.mubr.bf16.mxu1 %v5236_v4  ;;  %v5252_v7 = vld [vmem:[%s5529_s11] ss:$36 sps:$4 sm:$0xff]   ;;  %v5253_v11 = vld [vmem:[%s5529_s11 + $0x48] ss:$36 sps:$4 sm:$0xff]   ;;  %v5254_v13 = vld [vmem:[%s5529_s11 + $0x90] ss:$36 sps:$4 sm:$0xff]  }
  0x13   : > { %4442 = vmatpush3.bf16.msra.mxu1 %v5524_v3  ;;  %4410 = vmatpush3.bf16.msra.mxu0 %v5524_v3  ;;  %v5242_v14 = vld [vmem:[%s5529_s11 + $0xdc] ss:$36 sps:$4 sm:$0xff]   ;;  %v5244_v16 = vld [vmem:[%s5529_s11 + $0x124] ss:$36 sps:$4 sm:$0xff]   ;;  %v5246_v18 = vld [vmem:[%s5529_s11 + $0x16c] ss:$36 sps:$4 sm:$0xff]  }
  0x14   : > { %4443 = vmatprep.subr.bf16.mxu1 %v5541_v5  ;;  %4411 = vmatprep.subr.bf16.mxu0 %v5541_v5  ;;  %v5255_v15 = vld [vmem:[%s5529_s11 + $0xd8] ss:$36 sps:$4 sm:$0xff]   ;;  %v5256_v17 = vld [vmem:[%s5529_s11 + $0x120] ss:$36 sps:$4 sm:$0xff]   ;;  %v5257_v19 = vld [vmem:[%s5529_s11 + $0x168] ss:$36 sps:$4 sm:$0xff]  }
  0x15   : > { %4419 = vmatprep.mubr.bf16.mxu0 %v5252_v7  ;;  %v5248_v20 = vld [vmem:[%s5529_s11 + $0x1b4] ss:$36 sps:$4 sm:$0xff]   ;;  %v5250_v22 = vld [vmem:[%s5529_s11 + $0x1fc] ss:$36 sps:$4 sm:$0xff]   ;;  %v5260_v24 = vld [vmem:[%s5529_s11 + $0x8] ss:$36 sps:$4 sm:$0xff]  }
  0x16   : > { %v5258_v21 = vld [vmem:[%s5529_s11 + $0x1b0] ss:$36 sps:$4 sm:$0xff]   ;;  %v5259_v23 = vld [vmem:[%s5529_s11 + $0x1f8] ss:$36 sps:$4 sm:$0xff]   ;;  %v5266_v29 = vld [vmem:[%s5529_s11 + $0xe0] ss:$36 sps:$4 sm:$0xff]  }
  0x17   : > { %4444 = vmatpush3.bf16.msra.mxu1 %v5541_v5  ;;  %4412 = vmatpush3.bf16.msra.mxu0 %v5541_v5  ;;  %v5262_v25 = vld [vmem:[%s5529_s11 + $0x50] ss:$36 sps:$4 sm:$0xff]   ;;  %v5264_v26 = vld [vmem:[%s5529_s11 + $0x98] ss:$36 sps:$4 sm:$0xff]   ;;  %v5268_v30 = vld [vmem:[%s5529_s11 + $0x128] ss:$36 sps:$4 sm:$0xff]  }
  0x18   : > { %4445 = vmatprep.subr.bf16.mxu1 %v5550_v6  ;;  %4413 = vmatprep.subr.bf16.mxu0 %v5550_v6  ;;  %v5270_v33 = vld [vmem:[%s5529_s11 + $0x170] ss:$36 sps:$4 sm:$0xff]   ;;  %v5272_v34 = vld [vmem:[%s5529_s11 + $0x1b8] ss:$36 sps:$4 sm:$0xff]   ;;  %v5274_v37 = vld [vmem:[%s5529_s11 + $0x200] ss:$36 sps:$4 sm:$0xff]  }
  0x19   : > { %v5276_v38 = vld [vmem:[%s5529_s11 + $0xc] ss:$36 sps:$4 sm:$0xff]   ;;  %v5277_v39 = vld [vmem:[%s5529_s11 + $0x54] ss:$36 sps:$4 sm:$0xff]   ;;  %v5278_v40 = vld [vmem:[%s5529_s11 + $0x9c] ss:$36 sps:$4 sm:$0xff]  }
  0x1a   : > { %v5279_v41 = vld [vmem:[%s5529_s11 + $0xe4] ss:$36 sps:$4 sm:$0xff]   ;;  %v5280_v42 = vld [vmem:[%s5529_s11 + $0x12c] ss:$36 sps:$4 sm:$0xff]   ;;  %v5281_v43 = vld [vmem:[%s5529_s11 + $0x174] ss:$36 sps:$4 sm:$0xff]  }
  0x1b   : > { %4446 = vmatpush3.bf16.msra.mxu1 %v5550_v6  ;;  %4414 = vmatpush3.bf16.msra.mxu0 %v5550_v6  ;;  %v5282_v44 = vld [vmem:[%s5529_s11 + $0x1bc] ss:$36 sps:$4 sm:$0xff]   ;;  %v5283_v45 = vld [vmem:[%s5529_s11 + $0x204] ss:$36 sps:$4 sm:$0xff]   ;;  %v5284_v47 = vld [vmem:[%s5529_s11 + $0x10] ss:$36 sps:$4 sm:$0xff]  }
  0x1c   : > { %4447 = vmatprep.subr.bf16.mxu1 %v5560_v8  ;;  %4415 = vmatprep.subr.bf16.mxu0 %v5560_v8  ;;  %v5286_v49 = vld [vmem:[%s5529_s11 + $0x58] ss:$36 sps:$4 sm:$0xff]   ;;  %v5288_v51 = vld [vmem:[%s5529_s11 + $0xa0] ss:$36 sps:$4 sm:$0xff]   ;;  %v5290_v52 = vld [vmem:[%s5529_s11 + $0xe8] ss:$36 sps:$4 sm:$0xff]  }
  0x1d   : > { %v5292_v53 = vld [vmem:[%s5529_s11 + $0x130] ss:$36 sps:$4 sm:$0xff]   ;;  %v5294_v54 = vld [vmem:[%s5529_s11 + $0x178] ss:$36 sps:$4 sm:$0xff]   ;;  %v5296_v55 = vld [vmem:[%s5529_s11 + $0x1c0] ss:$36 sps:$4 sm:$0xff]  }
  0x1e   : > { %v5298_v56 = vld [vmem:[%s5529_s11 + $0x208] ss:$36 sps:$4 sm:$0xff]   ;;  %v5300_v57 = vld [vmem:[%s5529_s11 + $0x14] ss:$36 sps:$4 sm:$0xff]   ;;  %v5301_v58 = vld [vmem:[%s5529_s11 + $0x5c] ss:$36 sps:$4 sm:$0xff]  }
  0x1f   : > { %4448 = vmatpush3.bf16.msra.mxu1 %v5560_v8  ;;  %4416 = vmatpush3.bf16.msra.mxu0 %v5560_v8  ;;  %v5302_v59 = vld [vmem:[%s5529_s11 + $0xa4] ss:$36 sps:$4 sm:$0xff]   ;;  %v5303_v60 = vld [vmem:[%s5529_s11 + $0xec] ss:$36 sps:$4 sm:$0xff]   ;;  %v5304_v61 = vld [vmem:[%s5529_s11 + $0x134] ss:$36 sps:$4 sm:$0xff]  }
  0x20   : > { %4449 = vmatprep.subr.bf16.mxu1 %v5569_v9  ;;  %4417 = vmatprep.subr.bf16.mxu0 %v5569_v9  ;;  %v5305_v62 = vld [vmem:[%s5529_s11 + $0x17c] ss:$36 sps:$4 sm:$0xff]   ;;  %v5306_v63 = vld [vmem:[%s5529_s11 + $0x1c4] ss:$36 sps:$4 sm:$0xff]  }
  0x21   : > { %v5314_v4 = vld [vmem:[%s5529_s11 + $0xa8] ss:$36 sps:$4 sm:$0xff]   ;;  %v5428_v7 = vld [vmem:[%s6419_s1] sm:$0xff]  }
  0x23   : > { %4450 = vmatpush3.bf16.msra.mxu1 %v5569_v9  ;;  %4418 = vmatpush3.bf16.msra.mxu0 %v5569_v9 }
  0x24   : > { %4531 = vmatprep.subr.bf16.mxu1 %v5499_v0  ;;  %4467 = vmatprep.subr.bf16.mxu0 %v5310_v27 }
  0x26   : > { %4452 = vmatmul.mubr.bf16.vlgmr.msra.gmra.mrb[0].mxu1 %v5238_v10  ;;  %4420 = vmatmul.mubr.bf16.vlgmr.msra.gmra.mrb[0].mxu0 %v5253_v11  ;;  %v5429_v10 = vld [vmem:[%s6419_s1 + $0x8] sm:$0xff]   ;;  %v5317_v11 = vld [vmem:[%s5529_s11 + $0xf0] ss:$36 sps:$4 sm:$0xff]  }
  0x27   : > { %4455 = vmatprep.mubr.bf16.mxu1 %v5240_v12  ;;  %4532 = vmatpush3.bf16.msra.mxu1 %v5499_v0  ;;  %v5320_v12 = vld [vmem:[%s5529_s11 + $0x138] ss:$36 sps:$4 sm:$0xff]  }
  0x28   : > { %4533 = vmatprep.subr.bf16.mxu1 %v5504_v1  ;;  %4423 = vmatprep.mubr.bf16.mxu0 %v5254_v13  ;;  %v5430_v13 = vld [vmem:[%s6419_s1 + $0x10] sm:$0xff]  }
  0x29   : > { %4468 = vmatpush3.bf16.msra.mxu0 %v5310_v27 }
  0x2a   : > { %4469 = vmatprep.subr.bf16.mxu0 %v5313_v28 }
  0x2b   : > { %4534 = vmatpush3.bf16.msra.mxu1 %v5504_v1 }
  0x2c   : > { %4535 = vmatprep.subr.bf16.mxu1 %v5516_v2 }
  0x2d   : > { %4470 = vmatpush3.bf16.msra.mxu0 %v5313_v28 }
  0x2e   : > { %4456 = vmatmul.mubr.bf16.gmra.mrb[4].mxu1 %v5242_v14  ;;  %4424 = vmatmul.mubr.bf16.gmra.mrb[4].mxu0 %v5255_v15  ;;  %v5323_v14 = vld [vmem:[%s5529_s11 + $0x180] ss:$36 sps:$4 sm:$0xff]   ;;  %v5326_v15 = vld [vmem:[%s5529_s11 + $0x1c8] ss:$36 sps:$4 sm:$0xff]  }
  0x2f   : > { %4459 = vmatprep.mubr.bf16.mxu1 %v5244_v16  ;;  %4536 = vmatpush3.bf16.msra.mxu1 %v5516_v2  ;;  %v5329_v16 = vld [vmem:[%s5529_s11 + $0x210] ss:$36 sps:$4 sm:$0xff]  }
  0x30   : > { %4537 = vmatprep.subr.bf16.mxu1 %v5524_v3  ;;  %4427 = vmatprep.mubr.bf16.mxu0 %v5256_v17  ;;  %v5332_v17 = vld [vmem:[%s5529_s11 + $0x1c] ss:$36 sps:$4 sm:$0xff]  }
  0x31   : > { %4471 = vmatprep.subr.bf16.mxu0 %v5316_v31 }
  0x32   : > { %4472 = vmatpush3.bf16.msra.mxu0 %v5316_v31 }
  0x33   : > { %4538 = vmatpush3.bf16.msra.mxu1 %v5524_v3  ;;  %4473 = vmatprep.subr.bf16.mxu0 %v5319_v32 }
  0x34   : > { %4539 = vmatprep.subr.bf16.mxu1 %v5541_v5 }
  0x36   : > { %4460 = vmatmul.mubr.bf16.gmra.mrb[8].mxu1 %v5246_v18  ;;  %4428 = vmatmul.mubr.bf16.gmra.mrb[8].mxu0 %v5257_v19  ;;  %v5338_v18 = vld [vmem:[%s5529_s11 + $0xf4] ss:$36 sps:$4 sm:$0xff]   ;;  %v5340_v19 = vld [vmem:[%s5529_s11 + $0x13c] ss:$36 sps:$4 sm:$0xff]  }
  0x37   : > { %4463 = vmatprep.mubr.bf16.mxu1 %v5248_v20  ;;  %4540 = vmatpush3.bf16.msra.mxu1 %v5541_v5 }
  0x38   : > { %4541 = vmatprep.subr.bf16.mxu1 %v5550_v6  ;;  %4431 = vmatprep.mubr.bf16.mxu0 %v5258_v21  ;;  %v5342_v21 = vld [vmem:[%s5529_s11 + $0x184] ss:$36 sps:$4 sm:$0xff]  }
  0x39   : > { %4474 = vmatpush3.bf16.msra.mxu0 %v5319_v32 }
  0x3a   : > { %4475 = vmatprep.subr.bf16.mxu0 %v5322_v35 }
  0x3b   : > { %4542 = vmatpush3.bf16.msra.mxu1 %v5550_v6 }
  0x3c   : > { %4543 = vmatprep.subr.bf16.mxu1 %v5560_v8 }
  0x3d   : > { %4476 = vmatpush3.bf16.msra.mxu0 %v5322_v35 }
  0x3e   : > { %4464 = vmatmul.mubr.bf16.gmra.mrb[12].mxu1 %v5250_v22  ;;  %4432 = vmatmul.mubr.bf16.gmra.mrb[12].mxu0 %v5259_v23  ;;  %v355_v22 = vld [vmem:[%s6423_s5] sm:$0xff]  ;;  %v5344_v23 = vld [vmem:[%s5529_s11 + $0x1cc] ss:$36 sps:$4 sm:$0xff]  }
  0x3f   : > { %4544 = vmatpush3.bf16.msra.mxu1 %v5560_v8  ;;  %4547 = vmatprep.mubr.bf16.mxu1 %v5260_v24  ;;  %v5432_v24 = vld [vmem:[%s6419_s1 + $0x20] sm:$0xff]  }
  0x40   : > { %4545 = vmatprep.subr.bf16.mxu1 %v5569_v9  ;;  %4477 = vmatprep.subr.bf16.mxu0 %v5325_v36 }
  0x41   : > { %4478 = vmatpush3.bf16.msra.mxu0 %v5325_v36 }
  0x42   : > { %4479 = vmatprep.subr.bf16.mxu0 %v5328_v46 }
  0x43   : > { %4546 = vmatpush3.bf16.msra.mxu1 %v5569_v9 }
  0x44   : > { %4595 = vmatprep.subr.bf16.mxu1 %v5499_v0 }
  0x45   : > { %4480 = vmatpush3.bf16.msra.mxu0 %v5328_v46 }
  0x46   : > { %4548 = vmatmul.mubr.bf16.vlgmr.msra.gmra.mrb[16].mxu1 %v5262_v25  ;;  %4481 = vmatprep.subr.bf16.mxu0 %v5331_v48 }
  0x47   : > { %4596 = vmatpush3.bf16.msra.mxu1 %v5499_v0  ;;  %4551 = vmatprep.mubr.bf16.mxu1 %v5264_v26  ;;  %v5433_v26 = vld [vmem:[%s6419_s1 + $0x28] sm:$0xff]  }
  0x48   : > { %4597 = vmatprep.subr.bf16.mxu1 %v5504_v1 }
  0x49   : > { %4482 = vmatpush3.bf16.msra.mxu0 %v5331_v48 }
  0x4a   : > { %4499 = vmatprep.subr.bf16.mxu0 %v5684_v50 }
  0x4b   : > { %4598 = vmatpush3.bf16.msra.mxu1 %v5504_v1 }
  0x4c   : > { %4599 = vmatprep.subr.bf16.mxu1 %v5516_v2 }
  0x4e   : > { %4552 = vmatmul.mubr.bf16.gmra.mrb[20].mxu1 %v5266_v29 }
  0x4f   : > { %4600 = vmatpush3.bf16.msra.mxu1 %v5516_v2  ;;  %4555 = vmatprep.mubr.bf16.mxu1 %v5268_v30 }
  0x50   : > { %4601 = vmatprep.subr.bf16.mxu1 %v5524_v3 }
  0x53   : > { %4602 = vmatpush3.bf16.msra.mxu1 %v5524_v3 }
  0x54   : > { %4603 = vmatprep.subr.bf16.mxu1 %v5541_v5 }
  0x56   : > { %4556 = vmatmul.mubr.bf16.gmra.mrb[24].mxu1 %v5270_v33  ;;  %v5346_v33 = vld [vmem:[%s5529_s11 + $0x214] ss:$36 sps:$4 sm:$0xff]  }
  0x57   : > { %4604 = vmatpush3.bf16.msra.mxu1 %v5541_v5  ;;  %4559 = vmatprep.mubr.bf16.mxu1 %v5272_v34 }
  0x58   : > { %4605 = vmatprep.subr.bf16.mxu1 %v5550_v6 }
  0x5b   : > { %4606 = vmatpush3.bf16.msra.mxu1 %v5550_v6 }
  0x5c   : > { %4607 = vmatprep.subr.bf16.mxu1 %v5560_v8 }
  0x5e   : > { %4560 = vmatmul.mubr.bf16.gmra.mrb[28].mxu1 %v5274_v37 }
  0x5f   : > { %4608 = vmatpush3.bf16.msra.mxu1 %v5560_v8  ;;  %4611 = vmatprep.mubr.bf16.mxu1 %v5276_v38  ;;  %v5348_v38 = vld [vmem:[%s5529_s11 + $0x20] ss:$36 sps:$4 sm:$0xff]  }
  0x60   : > { %4609 = vmatprep.subr.bf16.mxu1 %v5569_v9 }
  0x63   : > { %4610 = vmatpush3.bf16.msra.mxu1 %v5569_v9 }
  0x64   : > { %4659 = vmatprep.subr.bf16.mxu1 %v5499_v0 }
  0x66   : > { %4612 = vmatmul.mubr.bf16.vlgmr.msra.gmra.mrb[32].mxu1 %v5277_v39 }
  0x67   : > { %4660 = vmatpush3.bf16.msra.mxu1 %v5499_v0  ;;  %4615 = vmatprep.mubr.bf16.mxu1 %v5278_v40 }
  0x68   : > { %4661 = vmatprep.subr.bf16.mxu1 %v5504_v1 }
  0x6b   : > { %4662 = vmatpush3.bf16.msra.mxu1 %v5504_v1 }
  0x6c   : > { %4663 = vmatprep.subr.bf16.mxu1 %v5516_v2 }
  0x6e   : > { %4616 = vmatmul.mubr.bf16.gmra.mrb[36].mxu1 %v5279_v41 }
  0x6f   : > { %4664 = vmatpush3.bf16.msra.mxu1 %v5516_v2  ;;  %4619 = vmatprep.mubr.bf16.mxu1 %v5280_v42 }
  0x70   : > { %4665 = vmatprep.subr.bf16.mxu1 %v5524_v3 }
  0x73   : > { %4666 = vmatpush3.bf16.msra.mxu1 %v5524_v3 }
  0x74   : > { %4667 = vmatprep.subr.bf16.mxu1 %v5541_v5 }
  0x76   : > { %4620 = vmatmul.mubr.bf16.gmra.mrb[40].mxu1 %v5281_v43 }
  0x77   : > { %4668 = vmatpush3.bf16.msra.mxu1 %v5541_v5  ;;  %4623 = vmatprep.mubr.bf16.mxu1 %v5282_v44  ;;  %v5434_v44 = vld [vmem:[%s6419_s1 + $0x30] sm:$0xff]  }
  0x78   : > { %4669 = vmatprep.subr.bf16.mxu1 %v5550_v6 }
  0x7b   : > { %4670 = vmatpush3.bf16.msra.mxu1 %v5550_v6 }
  0x7c   : > { %4671 = vmatprep.subr.bf16.mxu1 %v5560_v8 }
  0x7e   : > { %4624 = vmatmul.mubr.bf16.gmra.mrb[44].mxu1 %v5283_v45 }
  0x7f   : > { %4672 = vmatpush3.bf16.msra.mxu1 %v5560_v8  ;;  %4675 = vmatprep.mubr.bf16.mxu1 %v5284_v47 }
  0x80   : > { %4673 = vmatprep.subr.bf16.mxu1 %v5569_v9 }
  0x83   : > { %4674 = vmatpush3.bf16.msra.mxu1 %v5569_v9 }
  0x84   : > { %4723 = vmatprep.subr.bf16.mxu1 %v5499_v0 }
  0x86   : > { %4676 = vmatmul.mubr.bf16.vlgmr.msra.gmra.mrb[48].mxu1 %v5286_v49 }
  0x87   : > { %4724 = vmatpush3.bf16.msra.mxu1 %v5499_v0  ;;  %4679 = vmatprep.mubr.bf16.mxu1 %v5288_v51 }
  0x88   : > { %4725 = vmatprep.subr.bf16.mxu1 %v5504_v1 }
  0x8b   : > { %4726 = vmatpush3.bf16.msra.mxu1 %v5504_v1 }
  0x8c   : > { %4727 = vmatprep.subr.bf16.mxu1 %v5516_v2 }
  0x8e   : > { %4680 = vmatmul.mubr.bf16.gmra.mrb[52].mxu1 %v5290_v52 }
  0x8f   : > { %4728 = vmatpush3.bf16.msra.mxu1 %v5516_v2  ;;  %4683 = vmatprep.mubr.bf16.mxu1 %v5292_v53 }
  0x90   : > { %4729 = vmatprep.subr.bf16.mxu1 %v5524_v3 }
  0x93   : > { %4730 = vmatpush3.bf16.msra.mxu1 %v5524_v3 }
  0x94   : > { %4731 = vmatprep.subr.bf16.mxu1 %v5541_v5 }
  0x96   : > { %4684 = vmatmul.mubr.bf16.gmra.mrb[56].mxu1 %v5294_v54 }
  0x97   : > { %4732 = vmatpush3.bf16.msra.mxu1 %v5541_v5  ;;  %4687 = vmatprep.mubr.bf16.mxu1 %v5296_v55 }
  0x98   : > { %4733 = vmatprep.subr.bf16.mxu1 %v5550_v6 }
  0x9b   : > { %4734 = vmatpush3.bf16.msra.mxu1 %v5550_v6 }
  0x9c   : > { %4735 = vmatprep.subr.bf16.mxu1 %v5560_v8 }
  0x9e   : > { %4688 = vmatmul.mubr.bf16.gmra.mrb[60].mxu1 %v5298_v56 }
  0x9f   : > { %4736 = vmatpush3.bf16.msra.mxu1 %v5560_v8  ;;  %4739 = vmatprep.mubr.bf16.mxu1 %v5300_v57  ;;  %v5435_v57 = vld [vmem:[%s6419_s1 + $0x38] sm:$0xff]  }
  0xa0   : > { %4737 = vmatprep.subr.bf16.mxu1 %v5569_v9 }
  0xa3   : > { %4738 = vmatpush3.bf16.msra.mxu1 %v5569_v9 }
  0xa4   : > { %4787 = vmatprep.subr.bf16.mxu1 %v5499_v0 }
  0xa6   : > { %4740 = vmatmul.mubr.bf16.vlgmr.msra.gmra.mrb[64].mxu1 %v5301_v58 }
  0xa7   : > { %4788 = vmatpush3.bf16.msra.mxu1 %v5499_v0  ;;  %4743 = vmatprep.mubr.bf16.mxu1 %v5302_v59  ;;  %v5307_v0 = vld [vmem:[%s5529_s11 + $0x20c] ss:$36 sps:$4 sm:$0xff]  }
  0xa8   : > { %4789 = vmatprep.subr.bf16.mxu1 %v5504_v1 }
  0xab   : > { %4790 = vmatpush3.bf16.msra.mxu1 %v5504_v1  ;;  %v5308_v1 = vld [vmem:[%s5529_s11 + $0x18] ss:$36 sps:$4 sm:$0xff]  }
  0xac   : > { %4791 = vmatprep.subr.bf16.mxu1 %v5516_v2 }
  0xae   : > { %4744 = vmatmul.mubr.bf16.gmra.mrb[68].mxu1 %v5303_v60 }
  0xaf   : > { %4792 = vmatpush3.bf16.msra.mxu1 %v5516_v2  ;;  %4747 = vmatprep.mubr.bf16.mxu1 %v5304_v61  ;;  %v5311_v2 = vld [vmem:[%s5529_s11 + $0x60] ss:$36 sps:$4 sm:$0xff]  }
  0xb0   : > { %4793 = vmatprep.subr.bf16.mxu1 %v5524_v3 }
  0xb3   : > { %4794 = vmatpush3.bf16.msra.mxu1 %v5524_v3 }
  0xb4   : > { %4795 = vmatprep.subr.bf16.mxu1 %v5541_v5 }
  0xb6   : > { %4748 = vmatmul.mubr.bf16.gmra.mrb[72].mxu1 %v5305_v62 }
  0xb7   : > { %4796 = vmatpush3.bf16.msra.mxu1 %v5541_v5  ;;  %4751 = vmatprep.mubr.bf16.mxu1 %v5306_v63 }
  0xb8   : > { %4797 = vmatprep.subr.bf16.mxu1 %v5550_v6 }
  0xbb   : > { %4798 = vmatpush3.bf16.msra.mxu1 %v5550_v6 }
  0xbc   : > { %4799 = vmatprep.subr.bf16.mxu1 %v5560_v8 }
  0xbe   : > { %4752 = vmatmul.mubr.bf16.gmra.mrb[76].mxu1 %v5307_v0  ;;  %v5335_v0 = vld [vmem:[%s6420_s2 + $0x8] sm:$0xff]  }
  0xbf   : > { %4800 = vmatpush3.bf16.msra.mxu1 %v5560_v8  ;;  %4803 = vmatprep.mubr.bf16.mxu1 %v5308_v1 }
  0xc0   : > { %4801 = vmatprep.subr.bf16.mxu1 %v5569_v9 }
  0xc3   : > { %4802 = vmatpush3.bf16.msra.mxu1 %v5569_v9 }
  0xc4   : > { %4851 = vmatprep.subr.bf16.mxu1 %v5428_v7 }
  0xc6   : > { %4804 = vmatmul.mubr.bf16.vlgmr.msra.gmra.mrb[80].mxu1 %v5311_v2 }
  0xc7   : > { %4852 = vmatpush3.bf16.msra.mxu1 %v5428_v7  ;;  %4807 = vmatprep.mubr.bf16.mxu1 %v5314_v4  ;;  %v5350_v4 = vld [vmem:[%s5529_s11 + $0x68] ss:$36 sps:$4 sm:$0xff]  }
  0xc8   : > { %4853 = vmatprep.subr.bf16.mxu1 %v5429_v10 }
  0xcb   : > { %4854 = vmatpush3.bf16.msra.mxu1 %v5429_v10 }
  0xcc   : > { %4855 = vmatprep.subr.bf16.mxu1 %v5430_v13 }
  0xce   : > { %4808 = vmatmul.mubr.bf16.gmra.mrb[84].mxu1 %v5317_v11 }
  0xcf   : > { %4856 = vmatpush3.bf16.msra.mxu1 %v5430_v13  ;;  %4811 = vmatprep.mubr.bf16.mxu1 %v5320_v12 }
  0xd0   : > { %4857 = vmatprep.subr.bf16.mxu1 %v5524_v3 }
  0xd3   : > { %4858 = vmatpush3.bf16.msra.mxu1 %v5524_v3  ;;  %v5334_v3 = vld [vmem:[%s5529_s11 + $0x64] ss:$36 sps:$4 sm:$0xff]  }
  0xd4   : > { %4859 = vmatprep.subr.bf16.mxu1 %v5541_v5 }
  0xd6   : > { %4812 = vmatmul.mubr.bf16.gmra.mrb[88].mxu1 %v5323_v14 }
  0xd7   : > { %4860 = vmatpush3.bf16.msra.mxu1 %v5541_v5  ;;  %4815 = vmatprep.mubr.bf16.mxu1 %v5326_v15  ;;  %v5336_v5 = vld [vmem:[%s5529_s11 + $0xac] ss:$36 sps:$4 sm:$0xff]  }
  0xd8   : > { %4861 = vmatprep.subr.bf16.mxu1 %v5550_v6 }
  0xdb   : > { %4862 = vmatpush3.bf16.msra.mxu1 %v5550_v6  ;;  %v356_v6 = vlaneseq }
  0xdc   : > { %4863 = vmatprep.subr.bf16.mxu1 %v5560_v8 }
  0xde   : > { %4816 = vmatmul.mubr.bf16.gmra.mrb[92].mxu1 %v5329_v16 }
  0xdf   : > { %4864 = vmatpush3.bf16.msra.mxu1 %v5560_v8  ;;  %4867 = vmatprep.mubr.bf16.mxu1 %v5332_v17  ;;  %v5766_v8 = vshrl.u32 %v356_v6, 7 }
  0xe0   : > { %4865 = vmatprep.subr.bf16.mxu1 %v5569_v9 }
  0xe1   : > { %v358_v20 = vsub.s32 0, %v5766_v8 }
  0xe3   : > { %4866 = vmatpush3.bf16.msra.mxu1 %v5569_v9  ;;  %v5431_v9 = vld [vmem:[%s6419_s1 + $0x18] sm:$0xff]   ;;  %v5780_v25 = vrot.slane %v355_v22, %v358_v20  ;;  %v5337_v20 = vld [vmem:[%s6420_s2 + $0x10] sm:$0xff]  }
  0xe4   : > { %4915 = vmatprep.subr.bf16.mxu1 %v5428_v7 }
  0xe6   : > { %4868 = vmatmul.mubr.bf16.vlgmr.msra.gmra.mrb[96].mxu1 %v5334_v3 }
  0xe7   : > { %4916 = vmatpush3.bf16.msra.mxu1 %v5428_v7  ;;  %4871 = vmatprep.mubr.bf16.mxu1 %v5336_v5 }
  0xe8   : > { %4917 = vmatprep.subr.bf16.mxu1 %v5429_v10 }
  0xeb   : > { %4918 = vmatpush3.bf16.msra.mxu1 %v5429_v10 }
  0xec   : > { %4919 = vmatprep.subr.bf16.mxu1 %v5430_v13 }
  0xee   : > { %4872 = vmatmul.mubr.bf16.gmra.mrb[100].mxu1 %v5338_v18 }
  0xef   : > { %4920 = vmatpush3.bf16.msra.mxu1 %v5430_v13  ;;  %4875 = vmatprep.mubr.bf16.mxu1 %v5340_v19  ;;  %v5352_v13 = vld [vmem:[%s5529_s11 + $0xb0] ss:$36 sps:$4 sm:$0xff]  }
  0xf0   : > { %4921 = vmatprep.subr.bf16.mxu1 %v5431_v9 }
  0xf3   : > { %4922 = vmatpush3.bf16.msra.mxu1 %v5431_v9 }
  0xf4   : > { %4923 = vmatprep.subr.bf16.mxu1 %v5432_v24 }
  0xf6   : > { %4876 = vmatmul.mubr.bf16.gmra.mrb[104].mxu1 %v5342_v21 }
  0xf7   : > { %4924 = vmatpush3.bf16.msra.mxu1 %v5432_v24  ;;  %4879 = vmatprep.mubr.bf16.mxu1 %v5344_v23 }
  0xf8   : > { %4925 = vmatprep.subr.bf16.mxu1 %v5433_v26 }
  0xf9   : > { %v4453_v27 = vpop.f32.mrb[0].mxu1  ;;  %v4421_v28 = vpop.f32.mrb[0].mxu0 }
  0xfa   : > { %v668_v29 = vadd.f32 %v4453_v27, %v5780_v25  ;;  %v659_v30 = vpop.f32.mrb[1].mxu1  ;;  %v499_v31 = vadd.f32 %v4421_v28, %v5780_v25  ;;  %v490_v32 = vpop.f32.mrb[1].mxu0 }
  0xfb   : > { %v660_v34 = vadd.f32 %v659_v30, %v5780_v25  ;;  %v4454_v35 = vpop.f32.mrb[2].mxu1  ;;  %v491_v36 = vadd.f32 %v490_v32, %v5780_v25  ;;  %v4422_v37 = vpop.f32.mrb[2].mxu0  ;;  %4926 = vmatpush3.bf16.msra.mxu1 %v5433_v26 }
  0xfc   : > { %v671_v39 = vadd.f32 %v4454_v35, %v5780_v25  ;;  %v662_v40 = vpop.f32.mrb[3].mxu1  ;;  %v555_v41 = vmax.f32 %v499_v31, 0.0  ;;  %v502_v42 = vadd.f32 %v4422_v37, %v5780_v25  ;;  %v493_v43 = vpop.f32.mrb[3].mxu0  ;;  %4927 = vmatprep.subr.bf16.mxu1 %v5434_v44  ;;  %v724_v48 = vmax.f32 %v668_v29, 0.0 }
  0xfd   : > { %v663_v45 = vadd.f32 %v662_v40, %v5780_v25  ;;  %v553_v46 = vmax.f32 %v491_v36, 0.0  ;;  %v494_v47 = vadd.f32 %v493_v43, %v5780_v25  ;;  %v722_v52 = vmax.f32 %v660_v34, 0.0  ;;  %v5354_v36 = vld [vmem:[%s5529_s11 + $0xf8] ss:$36 sps:$4 sm:$0xff]  }
  0xfe   : > { %v725_v49 = vmax.f32 %v671_v39, 0.0  ;;  %v556_v51 = vmax.f32 %v502_v42, 0.0  ;;  %4880 = vmatmul.mubr.bf16.gmra.mrb[108].mxu1 %v5346_v33  ;;  %v5339_v33 = vld [vmem:[%s6420_s2 + $0x18] sm:$0xff]  }
  0xff   : > { %v723_v53 = vmax.f32 %v663_v45, 0.0  ;;  %v554_v54 = vmax.f32 %v494_v47, 0.0  ;;  %4928 = vmatpush3.bf16.msra.mxu1 %v5434_v44  ;;  %4931 = vmatprep.mubr.bf16.mxu1 %v5348_v38 }
 0x100   : > { %v739_v55 = vpack.c.bf16 %v725_v49, %v724_v48  ;;  %v5798_v56 = vpack.c.bf16 %v556_v51, %v555_v41  ;;  %4929 = vmatprep.subr.bf16.mxu1 %v5435_v57  ;;  %v5356_v41 = vld [vmem:[%s5529_s11 + $0x140] ss:$36 sps:$4 sm:$0xff]  }
 0x101   : > { %v738_v58 = vpack.c.bf16 %v723_v53, %v722_v52  ;;  %v4457_v59 = vpop.f32.mrb[4].mxu1  ;;  %v5803_v60 = vpack.c.bf16 %v554_v54, %v553_v46  ;;  %v4425_v61 = vpop.f32.mrb[4].mxu0  ;;  %v5341_v53 = vld [vmem:[%s6420_s2 + $0x20] sm:$0xff]  }
 0x102   : > { %v684_v62 = vadd.f32 %v4457_v59, %v5780_v25  ;;  %v675_v63 = vpop.f32.mrb[5].mxu1  ;;  %v515_v1 = vadd.f32 %v4425_v61, %v5780_v25  ;;  %v506_v2 = vpop.f32.mrb[5].mxu0 }
 0x103   : > { %v676_v7 = vadd.f32 %v675_v63, %v5780_v25  ;;  %v4458_v10 = vpop.f32.mrb[6].mxu1  ;;  %4483 = vmatprep.mubr.bf16.mxu0 %v738_v58  ;;  %v507_v11 = vadd.f32 %v506_v2, %v5780_v25  ;;  %v4426_v12 = vpop.f32.mrb[6].mxu0  ;;  %4930 = vmatpush3.bf16.msra.mxu1 %v5435_v57 }
 0x104   : > { %v687_v14 = vadd.f32 %v4458_v10, %v5780_v25  ;;  %v678_v15 = vpop.f32.mrb[7].mxu1  ;;  %4484 = vmatmul.mubr.bf16.vlgmr.msra.gmra.mrb[16].mxu0 %v739_v55  ;;  %v559_v16 = vmax.f32 %v515_v1, 0.0  ;;  %v518_v17 = vadd.f32 %v4426_v12, %v5780_v25  ;;  %v509_v3 = vpop.f32.mrb[7].mxu0  ;;  %v728_v19 = vmax.f32 %v684_v62, 0.0  ;;  %v5358_v12 = vld [vmem:[%s5529_s11 + $0x188] ss:$36 sps:$4 sm:$0xff]  }
 0x105   : > { %v679_v5 = vadd.f32 %v678_v15, %v5780_v25  ;;  %4500 = vmatpush3.bf16.msra.mxu0 %v5684_v50  ;;  %v557_v6 = vmax.f32 %v507_v11, 0.0  ;;  %v510_v18 = vadd.f32 %v509_v3, %v5780_v25  ;;  %v726_v22 = vmax.f32 %v676_v7, 0.0  ;;  %v5343_v7 = vld [vmem:[%s6420_s2 + $0x28] sm:$0xff]  }
 0x106   : > { %v729_v9 = vmax.f32 %v687_v14, 0.0  ;;  %4501 = vmatprep.subr.bf16.mxu0 %v5335_v0  ;;  %v560_v21 = vmax.f32 %v518_v17, 0.0  ;;  %4932 = vmatmul.mubr.bf16.vlgmr.msra.gmra.mrb[112].mxu1 %v5350_v4  ;;  %v5360_v17 = vld [vmem:[%s5529_s11 + $0x1d0] ss:$36 sps:$4 sm:$0xff]  }
 0x107   : > { %v727_v23 = vmax.f32 %v679_v5, 0.0  ;;  %v558_v24 = vmax.f32 %v510_v18, 0.0  ;;  %4935 = vmatprep.mubr.bf16.mxu1 %v5352_v13 }
 0x108   : > { %v741_v26 = vpack.c.bf16 %v729_v9, %v728_v19  ;;  %v5822_v27 = vpack.c.bf16 %v560_v21, %v559_v16 }
 0x109   : > { %v740_v50 = vpack.c.bf16 %v727_v23, %v726_v22  ;;  %4502 = vmatpush3.bf16.msra.mxu0 %v5335_v0  ;;  %v4461_v28 = vpop.f32.mrb[8].mxu1  ;;  %v5824_v29 = vpack.c.bf16 %v558_v24, %v557_v6  ;;  %v4429_v30 = vpop.f32.mrb[8].mxu0  ;;  %v5345_v24 = vld [vmem:[%s6420_s2 + $0x30] sm:$0xff]  }
 0x10a   : > { %v700_v31 = vadd.f32 %v4461_v28, %v5780_v25  ;;  %v691_v32 = vpop.f32.mrb[9].mxu1  ;;  %4503 = vmatprep.subr.bf16.mxu0 %v5337_v20  ;;  %v531_v34 = vadd.f32 %v4429_v30, %v5780_v25  ;;  %v522_v35 = vpop.f32.mrb[9].mxu0 }
 0x10b   : > { %v692_v37 = vadd.f32 %v691_v32, %v5780_v25  ;;  %v4462_v38 = vpop.f32.mrb[10].mxu1  ;;  %4487 = vmatprep.mubr.bf16.mxu0 %v740_v50  ;;  %v523_v39 = vadd.f32 %v522_v35, %v5780_v25  ;;  %v4430_v40 = vpop.f32.mrb[10].mxu0 }
 0x10c   : > { %v703_v42 = vadd.f32 %v4462_v38, %v5780_v25  ;;  %v694_v43 = vpop.f32.mrb[11].mxu1  ;;  %4488 = vmatmul.mubr.bf16.gmra.mrb[20].mxu0 %v741_v26  ;;  %v563_v44 = vmax.f32 %v531_v34, 0.0  ;;  %v534_v45 = vadd.f32 %v4430_v40, %v5780_v25  ;;  %v525_v46 = vpop.f32.mrb[11].mxu0  ;;  %v732_v51 = vmax.f32 %v700_v31, 0.0 }
 0x10d   : > { %v695_v47 = vadd.f32 %v694_v43, %v5780_v25  ;;  %4504 = vmatpush3.bf16.msra.mxu0 %v5337_v20  ;;  %v561_v48 = vmax.f32 %v523_v39, 0.0  ;;  %v526_v49 = vadd.f32 %v525_v46, %v5780_v25  ;;  %v730_v55 = vmax.f32 %v692_v37, 0.0  ;;  %v5362_v39 = vld [vmem:[%s5529_s11 + $0x218] ss:$36 sps:$4 sm:$0xff]  }
 0x10e   : > { %v733_v52 = vmax.f32 %v703_v42, 0.0  ;;  %4505 = vmatprep.subr.bf16.mxu0 %v5339_v33  ;;  %v564_v54 = vmax.f32 %v534_v45, 0.0  ;;  %4936 = vmatmul.mubr.bf16.gmra.mrb[116].mxu1 %v5354_v36  ;;  %v5347_v36 = vld [vmem:[%s6420_s2 + $0x38] sm:$0xff]  }
 0x10f   : > { %v731_v57 = vmax.f32 %v695_v47, 0.0  ;;  %v562_v58 = vmax.f32 %v526_v49, 0.0  ;;  %4939 = vmatprep.mubr.bf16.mxu1 %v5356_v41  ;;  %v5349_v47 = vld [vmem:[%s6420_s2 + $0x80] sm:$0xff]  }
 0x110   : > { %v743_v59 = vpack.c.bf16 %v733_v52, %v732_v51  ;;  %v5842_v61 = vpack.c.bf16 %v564_v54, %v563_v44 }
 0x111   : > { %v742_v62 = vpack.c.bf16 %v731_v57, %v730_v55  ;;  %4506 = vmatpush3.bf16.msra.mxu0 %v5339_v33  ;;  %v4465_v63 = vpop.f32.mrb[12].mxu1  ;;  %v5844_v0 = vpack.c.bf16 %v562_v58, %v561_v48  ;;  %v4433_v1 = vpop.f32.mrb[12].mxu0 }
 0x112   : > { %v716_v2 = vadd.f32 %v4465_v63, %v5780_v25  ;;  %v707_v4 = vpop.f32.mrb[13].mxu1  ;;  %4507 = vmatprep.subr.bf16.mxu0 %v5341_v53  ;;  %v547_v10 = vadd.f32 %v4433_v1, %v5780_v25  ;;  %v538_v11 = vpop.f32.mrb[13].mxu0 }
 0x113   : > { %v708_v13 = vadd.f32 %v707_v4, %v5780_v25  ;;  %v4466_v14 = vpop.f32.mrb[14].mxu1  ;;  %4491 = vmatprep.mubr.bf16.mxu0 %v742_v62  ;;  %v539_v15 = vadd.f32 %v538_v11, %v5780_v25  ;;  %v4434_v16 = vpop.f32.mrb[14].mxu0  ;;  %v5353_v4 = vld [vmem:[%s6420_s2 + $0x90] sm:$0xff]  }
 0x114   : > { %v719_v3 = vadd.f32 %v4466_v14, %v5780_v25  ;;  %v710_v5 = vpop.f32.mrb[15].mxu1  ;;  %4492 = vmatmul.mubr.bf16.gmra.mrb[24].mxu0 %v743_v59  ;;  %v567_v6 = vmax.f32 %v547_v10, 0.0  ;;  %v550_v18 = vadd.f32 %v4434_v16, %v5780_v25  ;;  %v541_v19 = vpop.f32.mrb[15].mxu0  ;;  %v736_v22 = vmax.f32 %v716_v2, 0.0 }
 0x115   : > { %v711_v9 = vadd.f32 %v710_v5, %v5780_v25  ;;  %4508 = vmatpush3.bf16.msra.mxu0 %v5341_v53  ;;  %v565_v20 = vmax.f32 %v539_v15, 0.0  ;;  %v542_v21 = vadd.f32 %v541_v19, %v5780_v25  ;;  %v734_v50 = vmax.f32 %v708_v13, 0.0  ;;  %v5357_v19 = vld [vmem:[%s6420_s2 + $0xa0] sm:$0xff]  }
 0x116   : > { %v737_v23 = vmax.f32 %v719_v3, 0.0  ;;  %4509 = vmatprep.subr.bf16.mxu0 %v5343_v7  ;;  %v568_v26 = vmax.f32 %v550_v18, 0.0  ;;  %4940 = vmatmul.mubr.bf16.gmra.mrb[120].mxu1 %v5358_v12 }
 0x117   : > { %v735_v28 = vmax.f32 %v711_v9, 0.0  ;;  %v566_v30 = vmax.f32 %v542_v21, 0.0  ;;  %4943 = vmatprep.mubr.bf16.mxu1 %v5360_v17 }
 0x118   : > { %v745_v31 = vpack.c.bf16 %v737_v23, %v736_v22  ;;  %v5862_v32 = vpack.c.bf16 %v568_v26, %v567_v6 }
 0x119   : > { %v744_v33 = vpack.c.bf16 %v735_v28, %v734_v50  ;;  %4510 = vmatpush3.bf16.msra.mxu0 %v5343_v7  ;;  %v5864_v34 = vpack.c.bf16 %v566_v30, %v565_v20  ;;  %v4549_v35 = vpop.f32.mrb[16].mxu1 }
 0x11a   : > { %4511 = vmatprep.subr.bf16.mxu0 %v5345_v24  ;;  %v1143_v37 = vadd.f32 %v4549_v35, %v5780_v25  ;;  %v1134_v38 = vpop.f32.mrb[17].mxu1 }
 0x11b   : > { %4495 = vmatprep.mubr.bf16.mxu0 %v744_v33  ;;  %v1135_v40 = vadd.f32 %v1134_v38, %v5780_v25  ;;  %v4550_v41 = vpop.f32.mrb[18].mxu1 }
 0x11c   : > { %4496 = vmatmul.mubr.bf16.gmra.mrb[28].mxu0 %v745_v31  ;;  %v1199_v42 = vmax.f32 %v1143_v37, 0.0  ;;  %v1146_v43 = vadd.f32 %v4550_v41, %v5780_v25  ;;  %v1137_v44 = vpop.f32.mrb[19].mxu1 }
 0x11d   : > { %4512 = vmatpush3.bf16.msra.mxu0 %v5345_v24  ;;  %4515 = vmatprep.mubr.bf16.mxu0 %v5803_v60  ;;  %v1197_v45 = vmax.f32 %v1135_v40, 0.0  ;;  %v1138_v46 = vadd.f32 %v1137_v44, %v5780_v25  ;;  %v5351_v60 = vld [vmem:[%s6420_s2 + $0x88] sm:$0xff]  }
 0x11e   : > { %4513 = vmatprep.subr.bf16.mxu0 %v5347_v36  ;;  %v1200_v48 = vmax.f32 %v1146_v43, 0.0  ;;  %4944 = vmatmul.mubr.bf16.gmra.mrb[124].mxu1 %v5362_v39 }
 0x11f   : > { %v1198_v49 = vmax.f32 %v1138_v46, 0.0 }
 0x120   : > { %v5878_v51 = vpack.c.bf16 %v1200_v48, %v1199_v42 }
 0x121   : > { %4514 = vmatpush3.bf16.msra.mxu0 %v5347_v36  ;;  %v5880_v52 = vpack.c.bf16 %v1198_v49, %v1197_v45  ;;  %v4553_v53 = vpop.f32.mrb[20].mxu1  ;;  %v5361_v36 = vld [vmem:[%s6420_s2 + $0xb0] sm:$0xff]  }
 0x122   : > { %4563 = vmatprep.subr.bf16.mxu0 %v5349_v47  ;;  %v1159_v54 = vadd.f32 %v4553_v53, %v5780_v25  ;;  %v1150_v55 = vpop.f32.mrb[21].mxu1  ;;  %v5364_v53 = vld [vmem:[%s6420_s2 + $0xc0] sm:$0xff]  }
 0x123   : > { %v1151_v57 = vadd.f32 %v1150_v55, %v5780_v25  ;;  %v4554_v58 = vpop.f32.mrb[22].mxu1 }
 0x124   : > { %4516 = vmatmul.mubr.bf16.vlgmr.msra.gmra.mrb[16].mxu0 %v5798_v56  ;;  %v1203_v59 = vmax.f32 %v1159_v54, 0.0  ;;  %v1162_v62 = vadd.f32 %v4554_v58, %v5780_v25  ;;  %v1153_v63 = vpop.f32.mrb[23].mxu1 }
 0x125   : > { %4564 = vmatpush3.bf16.msra.mxu0 %v5349_v47  ;;  %4519 = vmatprep.mubr.bf16.mxu0 %v5824_v29  ;;  %v1201_v1 = vmax.f32 %v1151_v57, 0.0  ;;  %v1154_v2 = vadd.f32 %v1153_v63, %v5780_v25  ;;  %v5355_v29 = vld [vmem:[%s6420_s2 + $0x98] sm:$0xff]  }
 0x126   : > { %4565 = vmatprep.subr.bf16.mxu0 %v5351_v60  ;;  %v1204_v7 = vmax.f32 %v1162_v62, 0.0 }
 0x127   : > { %v1202_v10 = vmax.f32 %v1154_v2, 0.0 }
 0x128   : > { %v5894_v11 = vpack.c.bf16 %v1204_v7, %v1203_v59 }
 0x129   : > { %4566 = vmatpush3.bf16.msra.mxu0 %v5351_v60  ;;  %v5896_v56 = vpack.c.bf16 %v1202_v10, %v1201_v1  ;;  %v4557_v12 = vpop.f32.mrb[24].mxu1 }
 0x12a   : > { %4567 = vmatprep.subr.bf16.mxu0 %v5353_v4  ;;  %v1175_v13 = vadd.f32 %v4557_v12, %v5780_v25  ;;  %v1166_v14 = vpop.f32.mrb[25].mxu1  ;;  %v5366_v12 = vld [vmem:[%s6420_s2 + $0xd0] sm:$0xff]  }
 0x12b   : > { %v1167_v15 = vadd.f32 %v1166_v14, %v5780_v25  ;;  %v4558_v16 = vpop.f32.mrb[26].mxu1 }
 0x12c   : > { %4520 = vmatmul.mubr.bf16.gmra.mrb[20].mxu0 %v5822_v27  ;;  %v1207_v17 = vmax.f32 %v1175_v13, 0.0  ;;  %v1178_v3 = vadd.f32 %v4558_v16, %v5780_v25  ;;  %v1169_v5 = vpop.f32.mrb[27].mxu1 }
 0x12d   : > { %4568 = vmatpush3.bf16.msra.mxu0 %v5353_v4  ;;  %4523 = vmatprep.mubr.bf16.mxu0 %v5844_v0  ;;  %v1205_v6 = vmax.f32 %v1167_v15, 0.0  ;;  %v1170_v18 = vadd.f32 %v1169_v5, %v5780_v25  ;;  %v5359_v0 = vld [vmem:[%s6420_s2 + $0xa8] sm:$0xff]  }
 0x12e   : > { %4569 = vmatprep.subr.bf16.mxu0 %v5355_v29  ;;  %v1208_v9 = vmax.f32 %v1178_v3, 0.0 }
 0x12f   : > { %v1206_v20 = vmax.f32 %v1170_v18, 0.0 }
 0x130   : > { %v5910_v21 = vpack.c.bf16 %v1208_v9, %v1207_v17 }
 0x131   : > { %4570 = vmatpush3.bf16.msra.mxu0 %v5355_v29  ;;  %v5912_v27 = vpack.c.bf16 %v1206_v20, %v1205_v6  ;;  %v4561_v22 = vpop.f32.mrb[28].mxu1 }
 0x132   : > { %4571 = vmatprep.subr.bf16.mxu0 %v5357_v19  ;;  %v1191_v23 = vadd.f32 %v4561_v22, %v5780_v25  ;;  %v1182_v24 = vpop.f32.mrb[29].mxu1  ;;  %v5368_v22 = vld [vmem:[%s6420_s2 + $0xe0] sm:$0xff]  }
 0x133   : > { %v1183_v26 = vadd.f32 %v1182_v24, %v5780_v25  ;;  %v4562_v50 = vpop.f32.mrb[30].mxu1 }
 0x134   : > { %4524 = vmatmul.mubr.bf16.gmra.mrb[24].mxu0 %v5842_v61  ;;  %v1211_v28 = vmax.f32 %v1191_v23, 0.0  ;;  %v1194_v30 = vadd.f32 %v4562_v50, %v5780_v25  ;;  %v1185_v31 = vpop.f32.mrb[31].mxu1 }
 0x135   : > { %4572 = vmatpush3.bf16.msra.mxu0 %v5357_v19  ;;  %4527 = vmatprep.mubr.bf16.mxu0 %v5864_v34  ;;  %v1209_v33 = vmax.f32 %v1183_v26, 0.0  ;;  %v1186_v35 = vadd.f32 %v1185_v31, %v5780_v25  ;;  %v5363_v34 = vld [vmem:[%s6420_s2 + $0xb8] sm:$0xff]  }
 0x136   : > { %4573 = vmatprep.subr.bf16.mxu0 %v5359_v0  ;;  %v1212_v37 = vmax.f32 %v1194_v30, 0.0 }
 0x137   : > { %v1210_v38 = vmax.f32 %v1186_v35, 0.0 }
 0x138   : > { %v5926_v39 = vpack.c.bf16 %v1212_v37, %v1211_v28 }
 0x139   : > { %4574 = vmatpush3.bf16.msra.mxu0 %v5359_v0  ;;  %v5928_v61 = vpack.c.bf16 %v1210_v38, %v1209_v33  ;;  %v4613_v40 = vpop.f32.mrb[32].mxu1 }
 0x13a   : > { %4575 = vmatprep.subr.bf16.mxu0 %v5361_v36  ;;  %v1473_v41 = vadd.f32 %v4613_v40, %v5780_v25  ;;  %v1464_v42 = vpop.f32.mrb[33].mxu1  ;;  %v5370_v40 = vld [vmem:[%s6420_s2 + $0xf0] sm:$0xff]  }
 0x13b   : > { %v1465_v43 = vadd.f32 %v1464_v42, %v5780_v25  ;;  %v4614_v44 = vpop.f32.mrb[34].mxu1 }
 0x13c   : > { %4528 = vmatmul.mubr.bf16.gmra.mrb[28].mxu0 %v5862_v32  ;;  %v1529_v45 = vmax.f32 %v1473_v41, 0.0  ;;  %v1476_v46 = vadd.f32 %v4614_v44, %v5780_v25  ;;  %v1467_v47 = vpop.f32.mrb[35].mxu1 }
 0x13d   : > { %4576 = vmatpush3.bf16.msra.mxu0 %v5361_v36  ;;  %4579 = vmatprep.mubr.bf16.mxu0 %v5880_v52  ;;  %v1527_v48 = vmax.f32 %v1465_v43, 0.0  ;;  %v1468_v49 = vadd.f32 %v1467_v47, %v5780_v25  ;;  %v5365_v52 = vld [vmem:[%s6420_s2 + $0xc8] sm:$0xff]  }
 0x13e   : > { %4577 = vmatprep.subr.bf16.mxu0 %v5363_v34  ;;  %v1530_v60 = vmax.f32 %v1476_v46, 0.0 }
 0x13f   : > { %v1528_v54 = vmax.f32 %v1468_v49, 0.0 }
 0x140   : > { %v5942_v55 = vpack.c.bf16 %v1530_v60, %v1529_v45 }
 0x141   : > { %4578 = vmatpush3.bf16.msra.mxu0 %v5363_v34  ;;  %v5944_v32 = vpack.c.bf16 %v1528_v54, %v1527_v48  ;;  %v4617_v57 = vpop.f32.mrb[36].mxu1 }
 0x142   : > { %4627 = vmatprep.subr.bf16.mxu0 %v5364_v53  ;;  %v1489_v58 = vadd.f32 %v4617_v57, %v5780_v25  ;;  %v1480_v59 = vpop.f32.mrb[37].mxu1  ;;  %v5372_v57 = vld [vmem:[%s6420_s2 + $0x100] sm:$0xff]  }
 0x143   : > { %v1481_v62 = vadd.f32 %v1480_v59, %v5780_v25  ;;  %v4618_v63 = vpop.f32.mrb[38].mxu1 }
 0x144   : > { %4580 = vmatmul.mubr.bf16.vlgmr.msra.gmra.mrb[16].mxu0 %v5878_v51  ;;  %v1533_v1 = vmax.f32 %v1489_v58, 0.0  ;;  %v1492_v2 = vadd.f32 %v4618_v63, %v5780_v25  ;;  %v1483_v4 = vpop.f32.mrb[39].mxu1 }
 0x145   : > { %4628 = vmatpush3.bf16.msra.mxu0 %v5364_v53  ;;  %4583 = vmatprep.mubr.bf16.mxu0 %v5896_v56  ;;  %v1531_v7 = vmax.f32 %v1481_v62, 0.0  ;;  %v1484_v10 = vadd.f32 %v1483_v4, %v5780_v25  ;;  %v5367_v56 = vld [vmem:[%s6420_s2 + $0xd8] sm:$0xff]  }
 0x146   : > { %4629 = vmatprep.subr.bf16.mxu0 %v5365_v52  ;;  %v1534_v29 = vmax.f32 %v1492_v2, 0.0 }
 0x147   : > { %v1532_v13 = vmax.f32 %v1484_v10, 0.0 }
 0x148   : > { %v5958_v14 = vpack.c.bf16 %v1534_v29, %v1533_v1 }
 0x149   : > { %4630 = vmatpush3.bf16.msra.mxu0 %v5365_v52  ;;  %v5960_v51 = vpack.c.bf16 %v1532_v13, %v1531_v7  ;;  %v4621_v15 = vpop.f32.mrb[40].mxu1 }
 0x14a   : > { %4631 = vmatprep.subr.bf16.mxu0 %v5366_v12  ;;  %v1505_v16 = vadd.f32 %v4621_v15, %v5780_v25  ;;  %v1496_v17 = vpop.f32.mrb[41].mxu1  ;;  %v5374_v15 = vld [vmem:[%s6420_s2 + $0x110] sm:$0xff]  }
 0x14b   : > { %v1497_v3 = vadd.f32 %v1496_v17, %v5780_v25  ;;  %v4622_v5 = vpop.f32.mrb[42].mxu1 }
 0x14c   : > { %4584 = vmatmul.mubr.bf16.gmra.mrb[20].mxu0 %v5894_v11  ;;  %v1537_v6 = vmax.f32 %v1505_v16, 0.0  ;;  %v1508_v18 = vadd.f32 %v4622_v5, %v5780_v25  ;;  %v1499_v19 = vpop.f32.mrb[43].mxu1 }
 0x14d   : > { %4632 = vmatpush3.bf16.msra.mxu0 %v5366_v12  ;;  %4587 = vmatprep.mubr.bf16.mxu0 %v5912_v27  ;;  %v1535_v9 = vmax.f32 %v1497_v3, 0.0  ;;  %v1500_v20 = vadd.f32 %v1499_v19, %v5780_v25  ;;  %v5369_v27 = vld [vmem:[%s6420_s2 + $0xe8] sm:$0xff]  }
 0x14e   : > { %4633 = vmatprep.subr.bf16.mxu0 %v5367_v56  ;;  %v1538_v0 = vmax.f32 %v1508_v18, 0.0 }
 0x14f   : > { %v1536_v23 = vmax.f32 %v1500_v20, 0.0 }
 0x150   : > { %v5974_v24 = vpack.c.bf16 %v1538_v0, %v1537_v6 }
 0x151   : > { %4634 = vmatpush3.bf16.msra.mxu0 %v5367_v56  ;;  %v5976_v11 = vpack.c.bf16 %v1536_v23, %v1535_v9  ;;  %v4625_v26 = vpop.f32.mrb[44].mxu1 }
 0x152   : > { %4635 = vmatprep.subr.bf16.mxu0 %v5368_v22  ;;  %v1521_v50 = vadd.f32 %v4625_v26, %v5780_v25  ;;  %v1512_v28 = vpop.f32.mrb[45].mxu1  ;;  %v5376_v26 = vld [vmem:[%s6420_s2 + $0x120] sm:$0xff]  }
 0x153   : > { %v1513_v30 = vadd.f32 %v1512_v28, %v5780_v25  ;;  %v4626_v31 = vpop.f32.mrb[46].mxu1 }
 0x154   : > { %4588 = vmatmul.mubr.bf16.gmra.mrb[24].mxu0 %v5910_v21  ;;  %v1541_v33 = vmax.f32 %v1521_v50, 0.0  ;;  %v1524_v35 = vadd.f32 %v4626_v31, %v5780_v25  ;;  %v1515_v36 = vpop.f32.mrb[47].mxu1 }
 0x155   : > { %4636 = vmatpush3.bf16.msra.mxu0 %v5368_v22  ;;  %4591 = vmatprep.mubr.bf16.mxu0 %v5928_v61  ;;  %v1539_v37 = vmax.f32 %v1513_v30, 0.0  ;;  %v1516_v38 = vadd.f32 %v1515_v36, %v5780_v25  ;;  %v5371_v61 = vld [vmem:[%s6420_s2 + $0xf8] sm:$0xff]  }
 0x156   : > { %4637 = vmatprep.subr.bf16.mxu0 %v5369_v27  ;;  %v1542_v34 = vmax.f32 %v1524_v35, 0.0 }
 0x157   : > { %v1540_v41 = vmax.f32 %v1516_v38, 0.0 }
 0x158   : > { %v5990_v42 = vpack.c.bf16 %v1542_v34, %v1541_v33 }
 0x159   : > { %4638 = vmatpush3.bf16.msra.mxu0 %v5369_v27  ;;  %v5992_v21 = vpack.c.bf16 %v1540_v41, %v1539_v37  ;;  %v4677_v43 = vpop.f32.mrb[48].mxu1 }
 0x15a   : > { %4639 = vmatprep.subr.bf16.mxu0 %v5370_v40  ;;  %v1819_v44 = vadd.f32 %v4677_v43, %v5780_v25  ;;  %v1810_v45 = vpop.f32.mrb[49].mxu1  ;;  %v5378_v43 = vld [vmem:[%s6420_s2 + $0x130] sm:$0xff]  }
 0x15b   : > { %v1811_v46 = vadd.f32 %v1810_v45, %v5780_v25  ;;  %v4678_v47 = vpop.f32.mrb[50].mxu1 }
 0x15c   : > { %4592 = vmatmul.mubr.bf16.gmra.mrb[28].mxu0 %v5926_v39  ;;  %v1875_v48 = vmax.f32 %v1819_v44, 0.0  ;;  %v1822_v49 = vadd.f32 %v4678_v47, %v5780_v25  ;;  %v1813_v53 = vpop.f32.mrb[51].mxu1 }
 0x15d   : > { %4640 = vmatpush3.bf16.msra.mxu0 %v5370_v40  ;;  %4643 = vmatprep.mubr.bf16.mxu0 %v5944_v32  ;;  %v1873_v60 = vmax.f32 %v1811_v46, 0.0  ;;  %v1814_v54 = vadd.f32 %v1813_v53, %v5780_v25  ;;  %v5373_v32 = vld [vmem:[%s6420_s2 + $0x108] sm:$0xff]  }
 0x15e   : > { %4641 = vmatprep.subr.bf16.mxu0 %v5371_v61  ;;  %v1876_v52 = vmax.f32 %v1822_v49, 0.0 }
 0x15f   : > { %v1874_v58 = vmax.f32 %v1814_v54, 0.0 }
 0x160   : > { %v6006_v59 = vpack.c.bf16 %v1876_v52, %v1875_v48 }
 0x161   : > { %4642 = vmatpush3.bf16.msra.mxu0 %v5371_v61  ;;  %v6008_v39 = vpack.c.bf16 %v1874_v58, %v1873_v60  ;;  %v4681_v62 = vpop.f32.mrb[52].mxu1 }
 0x162   : > { %4691 = vmatprep.subr.bf16.mxu0 %v5372_v57  ;;  %v1835_v63 = vadd.f32 %v4681_v62, %v5780_v25  ;;  %v1826_v1 = vpop.f32.mrb[53].mxu1  ;;  %v5380_v62 = vld [vmem:[%s6420_s2 + $0x140] sm:$0xff]  }
 0x163   : > { %v1827_v2 = vadd.f32 %v1826_v1, %v5780_v25  ;;  %v4682_v4 = vpop.f32.mrb[54].mxu1 }
 0x164   : > { %4644 = vmatmul.mubr.bf16.vlgmr.msra.gmra.mrb[16].mxu0 %v5942_v55  ;;  %v1879_v7 = vmax.f32 %v1835_v63, 0.0  ;;  %v1838_v10 = vadd.f32 %v4682_v4, %v5780_v25  ;;  %v1829_v12 = vpop.f32.mrb[55].mxu1 }
 0x165   : > { %4692 = vmatpush3.bf16.msra.mxu0 %v5372_v57  ;;  %4647 = vmatprep.mubr.bf16.mxu0 %v5960_v51  ;;  %v1877_v29 = vmax.f32 %v1827_v2, 0.0  ;;  %v1830_v13 = vadd.f32 %v1829_v12, %v5780_v25  ;;  %v5375_v51 = vld [vmem:[%s6420_s2 + $0x118] sm:$0xff]  }
 0x166   : > { %4693 = vmatprep.subr.bf16.mxu0 %v5373_v32  ;;  %v1880_v56 = vmax.f32 %v1838_v10, 0.0 }
 0x167   : > { %v1878_v16 = vmax.f32 %v1830_v13, 0.0 }
 0x168   : > { %v6022_v17 = vpack.c.bf16 %v1880_v56, %v1879_v7 }
 0x169   : > { %4694 = vmatpush3.bf16.msra.mxu0 %v5373_v32  ;;  %v6024_v55 = vpack.c.bf16 %v1878_v16, %v1877_v29  ;;  %v4685_v3 = vpop.f32.mrb[56].mxu1 }
 0x16a   : > { %4695 = vmatprep.subr.bf16.mxu0 %v5374_v15  ;;  %v1851_v5 = vadd.f32 %v4685_v3, %v5780_v25  ;;  %v1842_v6 = vpop.f32.mrb[57].mxu1  ;;  %v5382_v3 = vld [vmem:[%s6420_s2 + $0x150] sm:$0xff]  }
 0x16b   : > { %v1843_v18 = vadd.f32 %v1842_v6, %v5780_v25  ;;  %v4686_v19 = vpop.f32.mrb[58].mxu1 }
 0x16c   : > { %4648 = vmatmul.mubr.bf16.gmra.mrb[20].mxu0 %v5958_v14  ;;  %v1883_v9 = vmax.f32 %v1851_v5, 0.0  ;;  %v1854_v20 = vadd.f32 %v4686_v19, %v5780_v25  ;;  %v1845_v22 = vpop.f32.mrb[59].mxu1 }
 0x16d   : > { %4696 = vmatpush3.bf16.msra.mxu0 %v5374_v15  ;;  %4651 = vmatprep.mubr.bf16.mxu0 %v5976_v11  ;;  %v1881_v0 = vmax.f32 %v1843_v18, 0.0  ;;  %v1846_v23 = vadd.f32 %v1845_v22, %v5780_v25  ;;  %v5377_v11 = vld [vmem:[%s6420_s2 + $0x128] sm:$0xff]  }
 0x16e   : > { %4697 = vmatprep.subr.bf16.mxu0 %v5375_v51  ;;  %v1884_v27 = vmax.f32 %v1854_v20, 0.0 }
 0x16f   : > { %v1882_v50 = vmax.f32 %v1846_v23, 0.0 }
 0x170   : > { %v6038_v28 = vpack.c.bf16 %v1884_v27, %v1883_v9 }
 0x171   : > { %4698 = vmatpush3.bf16.msra.mxu0 %v5375_v51  ;;  %v6040_v14 = vpack.c.bf16 %v1882_v50, %v1881_v0  ;;  %v4689_v30 = vpop.f32.mrb[60].mxu1 }
 0x172   : > { %4699 = vmatprep.subr.bf16.mxu0 %v5376_v26  ;;  %v1867_v31 = vadd.f32 %v4689_v30, %v5780_v25  ;;  %v1858_v33 = vpop.f32.mrb[61].mxu1  ;;  %v5384_v30 = vld [vmem:[%s6420_s2 + $0x160] sm:$0xff]  }
 0x173   : > { %v1859_v35 = vadd.f32 %v1858_v33, %v5780_v25  ;;  %v4690_v36 = vpop.f32.mrb[62].mxu1 }
 0x174   : > { %4652 = vmatmul.mubr.bf16.gmra.mrb[24].mxu0 %v5974_v24  ;;  %v1887_v37 = vmax.f32 %v1867_v31, 0.0  ;;  %v1870_v38 = vadd.f32 %v4690_v36, %v5780_v25  ;;  %v1861_v40 = vpop.f32.mrb[63].mxu1 }
 0x175   : > { %4700 = vmatpush3.bf16.msra.mxu0 %v5376_v26  ;;  %4655 = vmatprep.mubr.bf16.mxu0 %v5992_v21  ;;  %v1885_v34 = vmax.f32 %v1859_v35, 0.0  ;;  %v1862_v41 = vadd.f32 %v1861_v40, %v5780_v25  ;;  %v5379_v21 = vld [vmem:[%s6420_s2 + $0x138] sm:$0xff]  }
 0x176   : > { %4701 = vmatprep.subr.bf16.mxu0 %v5377_v11  ;;  %v1888_v61 = vmax.f32 %v1870_v38, 0.0 }
 0x177   : > { %v1886_v44 = vmax.f32 %v1862_v41, 0.0 }
 0x178   : > { %v6054_v45 = vpack.c.bf16 %v1888_v61, %v1887_v37 }
 0x179   : > { %4702 = vmatpush3.bf16.msra.mxu0 %v5377_v11  ;;  %v6056_v24 = vpack.c.bf16 %v1886_v44, %v1885_v34  ;;  %v4741_v46 = vpop.f32.mrb[64].mxu1 }
 0x17a   : > { %4703 = vmatprep.subr.bf16.mxu0 %v5378_v43  ;;  %v2149_v47 = vadd.f32 %v4741_v46, %v5780_v25  ;;  %v2140_v48 = vpop.f32.mrb[65].mxu1  ;;  %v5386_v46 = vld [vmem:[%s6420_s2 + $0x170] sm:$0xff]  }
 0x17b   : > { %v2141_v49 = vadd.f32 %v2140_v48, %v5780_v25  ;;  %v4742_v53 = vpop.f32.mrb[66].mxu1 }
 0x17c   : > { %4656 = vmatmul.mubr.bf16.gmra.mrb[28].mxu0 %v5990_v42  ;;  %v2205_v60 = vmax.f32 %v2149_v47, 0.0  ;;  %v2152_v54 = vadd.f32 %v4742_v53, %v5780_v25  ;;  %v2143_v57 = vpop.f32.mrb[67].mxu1 }
 0x17d   : > { %4704 = vmatpush3.bf16.msra.mxu0 %v5378_v43  ;;  %4707 = vmatprep.mubr.bf16.mxu0 %v6008_v39  ;;  %v2203_v52 = vmax.f32 %v2141_v49, 0.0  ;;  %v2144_v58 = vadd.f32 %v2143_v57, %v5780_v25  ;;  %v5381_v39 = vld [vmem:[%s6420_s2 + $0x148] sm:$0xff]  }
 0x17e   : > { %4705 = vmatprep.subr.bf16.mxu0 %v5379_v21  ;;  %v2206_v32 = vmax.f32 %v2152_v54, 0.0 }
 0x17f   : > { %v2204_v63 = vmax.f32 %v2144_v58, 0.0 }
 0x180   : > { %v6070_v1 = vpack.c.bf16 %v2206_v32, %v2205_v60  ;;  %v5412_v32 = vld [vmem:[%s6421_s3] sm:$0xff]  }
 0x181   : > { %4706 = vmatpush3.bf16.msra.mxu0 %v5379_v21  ;;  %v6072_v42 = vpack.c.bf16 %v2204_v63, %v2203_v52  ;;  %v4745_v2 = vpop.f32.mrb[68].mxu1  ;;  %v5413_v63 = vld [vmem:[%s6421_s3 + $0x8] sm:$0xff]   ;;  %4979 = vmatprep.subr.bf16.mxu1 %v5412_v32 }
 0x182   : > { %4755 = vmatprep.subr.bf16.mxu0 %v5380_v62  ;;  %v2165_v4 = vadd.f32 %v4745_v2, %v5780_v25  ;;  %v2156_v7 = vpop.f32.mrb[69].mxu1  ;;  %4980 = vmatpush3.bf16.msra.mxu1 %v5412_v32 }
 0x183   : > { %v2157_v10 = vadd.f32 %v2156_v7, %v5780_v25  ;;  %v4746_v12 = vpop.f32.mrb[70].mxu1  ;;  %4981 = vmatprep.subr.bf16.mxu1 %v5413_v63 }
 0x184   : > { %4708 = vmatmul.mubr.bf16.vlgmr.msra.gmra.mrb[16].mxu0 %v6006_v59  ;;  %v2209_v29 = vmax.f32 %v2165_v4, 0.0  ;;  %v2168_v13 = vadd.f32 %v4746_v12, %v5780_v25  ;;  %v2159_v15 = vpop.f32.mrb[71].mxu1  ;;  %v5414_v12 = vld [vmem:[%s6421_s3 + $0x10] sm:$0xff]  }
 0x185   : > { %4756 = vmatpush3.bf16.msra.mxu0 %v5380_v62  ;;  %4711 = vmatprep.mubr.bf16.mxu0 %v6024_v55  ;;  %v2207_v56 = vmax.f32 %v2157_v10, 0.0  ;;  %v2160_v16 = vadd.f32 %v2159_v15, %v5780_v25  ;;  %v5383_v55 = vld [vmem:[%s6420_s2 + $0x158] sm:$0xff]  }
 0x186   : > { %4757 = vmatprep.subr.bf16.mxu0 %v5381_v39  ;;  %v2210_v51 = vmax.f32 %v2168_v13, 0.0  ;;  %v5389_v13 = vld [vmem:[%s6420_s2 + $0x188] sm:$0xff]   ;;  %4982 = vmatpush3.bf16.msra.mxu1 %v5413_v63 }
 0x187   : > { %v2208_v5 = vmax.f32 %v2160_v16, 0.0  ;;  %4983 = vmatprep.subr.bf16.mxu1 %v5414_v12 }
 0x188   : > { %v6086_v6 = vpack.c.bf16 %v2210_v51, %v2209_v29 }
 0x189   : > { %4758 = vmatpush3.bf16.msra.mxu0 %v5381_v39  ;;  %v6088_v59 = vpack.c.bf16 %v2208_v5, %v2207_v56  ;;  %v4749_v18 = vpop.f32.mrb[72].mxu1 }
 0x18a   : > { %4759 = vmatprep.subr.bf16.mxu0 %v5382_v3  ;;  %v2181_v19 = vadd.f32 %v4749_v18, %v5780_v25  ;;  %v2172_v9 = vpop.f32.mrb[73].mxu1  ;;  %4984 = vmatpush3.bf16.msra.mxu1 %v5414_v12 }
 0x18b   : > { %v2173_v20 = vadd.f32 %v2172_v9, %v5780_v25  ;;  %v4750_v22 = vpop.f32.mrb[74].mxu1 }
 0x18c   : > { %4712 = vmatmul.mubr.bf16.gmra.mrb[20].mxu0 %v6022_v17  ;;  %v2213_v0 = vmax.f32 %v2181_v19, 0.0  ;;  %v2184_v23 = vadd.f32 %v4750_v22, %v5780_v25  ;;  %v2175_v26 = vpop.f32.mrb[75].mxu1 }
 0x18d   : > { %4760 = vmatpush3.bf16.msra.mxu0 %v5382_v3  ;;  %4715 = vmatprep.mubr.bf16.mxu0 %v6040_v14  ;;  %v2211_v27 = vmax.f32 %v2173_v20, 0.0  ;;  %v2176_v50 = vadd.f32 %v2175_v26, %v5780_v25  ;;  %v5385_v14 = vld [vmem:[%s6420_s2 + $0x168] sm:$0xff]  }
 0x18e   : > { %4761 = vmatprep.subr.bf16.mxu0 %v5383_v55  ;;  %v2214_v11 = vmax.f32 %v2184_v23, 0.0  ;;  %v5416_v23 = vld [vmem:[%s6421_s3 + $0x20] sm:$0xff]  }
 0x18f   : > { %v2212_v31 = vmax.f32 %v2176_v50, 0.0 }
 0x190   : > { %v6102_v33 = vpack.c.bf16 %v2214_v11, %v2213_v0 }
 0x191   : > { %4762 = vmatpush3.bf16.msra.mxu0 %v5383_v55  ;;  %v6104_v17 = vpack.c.bf16 %v2212_v31, %v2211_v27  ;;  %v4753_v35 = vpop.f32.mrb[76].mxu1  ;;  %v5415_v55 = vld [vmem:[%s6421_s3 + $0x18] sm:$0xff]  }
 0x192   : > { %4763 = vmatprep.subr.bf16.mxu0 %v5384_v30  ;;  %v2197_v36 = vadd.f32 %v4753_v35, %v5780_v25  ;;  %v2188_v37 = vpop.f32.mrb[77].mxu1  ;;  %4985 = vmatprep.subr.bf16.mxu1 %v5415_v55  ;;  %v5391_v27 = vld [vmem:[%s6420_s2 + $0x198] sm:$0xff]  }
 0x193   : > { %v2189_v38 = vadd.f32 %v2188_v37, %v5780_v25  ;;  %v4754_v40 = vpop.f32.mrb[78].mxu1  ;;  %4986 = vmatpush3.bf16.msra.mxu1 %v5415_v55  ;;  %v5417_v37 = vld [vmem:[%s6421_s3 + $0x28] sm:$0xff]  }
 0x194   : > { %4716 = vmatmul.mubr.bf16.gmra.mrb[24].mxu0 %v6038_v28  ;;  %v2217_v34 = vmax.f32 %v2197_v36, 0.0  ;;  %v2200_v41 = vadd.f32 %v4754_v40, %v5780_v25  ;;  %v2191_v43 = vpop.f32.mrb[79].mxu1  ;;  %4987 = vmatprep.subr.bf16.mxu1 %v5416_v23 }
 0x195   : > { %4764 = vmatpush3.bf16.msra.mxu0 %v5384_v30  ;;  %4719 = vmatprep.mubr.bf16.mxu0 %v6056_v24  ;;  %v2215_v61 = vmax.f32 %v2189_v38, 0.0  ;;  %v2192_v44 = vadd.f32 %v2191_v43, %v5780_v25  ;;  %v5387_v24 = vld [vmem:[%s6420_s2 + $0x178] sm:$0xff]  }
 0x196   : > { %4765 = vmatprep.subr.bf16.mxu0 %v5385_v14  ;;  %v2218_v21 = vmax.f32 %v2200_v41, 0.0 }
 0x197   : > { %v2216_v47 = vmax.f32 %v2192_v44, 0.0  ;;  %4988 = vmatpush3.bf16.msra.mxu1 %v5416_v23 }
 0x198   : > { %v6118_v48 = vpack.c.bf16 %v2218_v21, %v2217_v34  ;;  %4989 = vmatprep.subr.bf16.mxu1 %v5417_v37 }
 0x199   : > { %4766 = vmatpush3.bf16.msra.mxu0 %v5385_v14  ;;  %v6120_v28 = vpack.c.bf16 %v2216_v47, %v2215_v61  ;;  %v4805_v49 = vpop.f32.mrb[80].mxu1 }
 0x19a   : > { %4767 = vmatprep.subr.bf16.mxu0 %v5386_v46  ;;  %v2495_v53 = vadd.f32 %v4805_v49, %v5780_v25  ;;  %v2486_v60 = vpop.f32.mrb[81].mxu1 }
 0x19b   : > { %v2487_v54 = vadd.f32 %v2486_v60, %v5780_v25  ;;  %v4806_v57 = vpop.f32.mrb[82].mxu1  ;;  %4990 = vmatpush3.bf16.msra.mxu1 %v5417_v37 }
 0x19c   : > { %4720 = vmatmul.mubr.bf16.gmra.mrb[28].mxu0 %v6054_v45  ;;  %v2551_v52 = vmax.f32 %v2495_v53, 0.0  ;;  %v2498_v58 = vadd.f32 %v4806_v57, %v5780_v25  ;;  %v2489_v62 = vpop.f32.mrb[83].mxu1  ;;  %v5388_v45 = vld [vmem:[%s6420_s2 + $0x180] sm:$0xff]  }
 0x19d   : > { %4768 = vmatpush3.bf16.msra.mxu0 %v5386_v46  ;;  %4771 = vmatprep.mubr.bf16.mxu0 %v6072_v42  ;;  %v2549_v2 = vmax.f32 %v2487_v54, 0.0  ;;  %v2490_v39 = vadd.f32 %v2489_v62, %v5780_v25 }
 0x19e   : > { %4769 = vmatprep.subr.bf16.mxu0 %v5387_v24  ;;  %v2552_v4 = vmax.f32 %v2498_v58, 0.0 }
 0x19f   : > { %v2550_v7 = vmax.f32 %v2490_v39, 0.0 }
 0x1a0   : > { %v6140_v10 = vpack.c.bf16 %v2552_v4, %v2551_v52  ;;  %v5394_v52 = vld [vmem:[%s6420_s2 + $0x1b0] sm:$0xff]  }
 0x1a1   : > { %4770 = vmatpush3.bf16.msra.mxu0 %v5387_v24  ;;  %v6145_v42 = vpack.c.bf16 %v2550_v7, %v2549_v2  ;;  %v4809_v29 = vpop.f32.mrb[84].mxu1 }
 0x1a2   : > { %4819 = vmatprep.subr.bf16.mxu0 %v5388_v45  ;;  %v2511_v15 = vadd.f32 %v4809_v29, %v5780_v25  ;;  %v2502_v56 = vpop.f32.mrb[85].mxu1 }
 0x1a3   : > { %v2503_v16 = vadd.f32 %v2502_v56, %v5780_v25  ;;  %v4810_v3 = vpop.f32.mrb[86].mxu1  ;;  %v5396_v56 = vld [vmem:[%s6420_s2 + $0x1c0] sm:$0xff]  }
 0x1a4   : > { %4772 = vmatmul.mubr.bf16.vlgmr.msra.gmra.mrb[16].mxu0 %v6070_v1  ;;  %v2555_v51 = vmax.f32 %v2511_v15, 0.0  ;;  %v2514_v5 = vadd.f32 %v4810_v3, %v5780_v25  ;;  %v2505_v18 = vpop.f32.mrb[87].mxu1  ;;  %v5390_v1 = vld [vmem:[%s6420_s2 + $0x190] sm:$0xff]  }
 0x1a5   : > { %4820 = vmatpush3.bf16.msra.mxu0 %v5388_v45  ;;  %4775 = vmatprep.mubr.bf16.mxu0 %v6088_v59  ;;  %v2553_v19 = vmax.f32 %v2503_v16, 0.0  ;;  %v2506_v9 = vadd.f32 %v2505_v18, %v5780_v25 }
 0x1a6   : > { %4821 = vmatprep.subr.bf16.mxu0 %v5389_v13  ;;  %v2556_v20 = vmax.f32 %v2514_v5, 0.0 }
 0x1a7   : > { %v2554_v22 = vmax.f32 %v2506_v9, 0.0 }
 0x1a8   : > { %v6162_v0 = vpack.c.bf16 %v2556_v20, %v2555_v51 }
 0x1a9   : > { %4822 = vmatpush3.bf16.msra.mxu0 %v5389_v13  ;;  %v6167_v59 = vpack.c.bf16 %v2554_v22, %v2553_v19  ;;  %v4813_v26 = vpop.f32.mrb[88].mxu1 }
 0x1aa   : > { %4823 = vmatprep.subr.bf16.mxu0 %v5390_v1  ;;  %v2527_v50 = vadd.f32 %v4813_v26, %v5780_v25  ;;  %v2518_v30 = vpop.f32.mrb[89].mxu1 }
 0x1ab   : > { %v2519_v11 = vadd.f32 %v2518_v30, %v5780_v25  ;;  %v4814_v31 = vpop.f32.mrb[90].mxu1 }
 0x1ac   : > { %4776 = vmatmul.mubr.bf16.gmra.mrb[20].mxu0 %v6086_v6  ;;  %v2559_v35 = vmax.f32 %v2527_v50, 0.0  ;;  %v2530_v14 = vadd.f32 %v4814_v31, %v5780_v25  ;;  %v2521_v36 = vpop.f32.mrb[91].mxu1  ;;  %v5392_v6 = vld [vmem:[%s6420_s2 + $0x1a0] sm:$0xff]  }
 0x1ad   : > { %4824 = vmatpush3.bf16.msra.mxu0 %v5390_v1  ;;  %4779 = vmatprep.mubr.bf16.mxu0 %v6104_v17  ;;  %v2557_v38 = vmax.f32 %v2519_v11, 0.0  ;;  %v2522_v40 = vadd.f32 %v2521_v36, %v5780_v25  ;;  %v5393_v17 = vld [vmem:[%s6420_s2 + $0x1a8] sm:$0xff]  }
 0x1ae   : > { %4825 = vmatprep.subr.bf16.mxu0 %v5391_v27  ;;  %v2560_v34 = vmax.f32 %v2530_v14, 0.0 }
 0x1af   : > { %v2558_v41 = vmax.f32 %v2522_v40, 0.0 }
 0x1b0   : > { %v6184_v43 = vpack.c.bf16 %v2560_v34, %v2559_v35 }
 0x1b1   : > { %4826 = vmatpush3.bf16.msra.mxu0 %v5391_v27  ;;  %v6186_v61 = vpack.c.bf16 %v2558_v41, %v2557_v38  ;;  %v4817_v44 = vpop.f32.mrb[92].mxu1  ;;  %v5398_v27 = vld [vmem:[%s6420_s2 + $0x1d0] sm:$0xff]  }
 0x1b2   : > { %4827 = vmatprep.subr.bf16.mxu0 %v5392_v6  ;;  %v2543_v46 = vadd.f32 %v4817_v44, %v5780_v25  ;;  %v2534_v21 = vpop.f32.mrb[93].mxu1  ;;  %v5400_v44 = vld [vmem:[%s6420_s2 + $0x1e0] sm:$0xff]  }
 0x1b3   : > { %v2535_v47 = vadd.f32 %v2534_v21, %v5780_v25  ;;  %v4818_v49 = vpop.f32.mrb[94].mxu1 }
 0x1b4   : > { %4780 = vmatmul.mubr.bf16.gmra.mrb[24].mxu0 %v6102_v33  ;;  %v2563_v24 = vmax.f32 %v2543_v46, 0.0  ;;  %v2546_v53 = vadd.f32 %v4818_v49, %v5780_v25  ;;  %v2537_v60 = vpop.f32.mrb[95].mxu1 }
 0x1b5   : > { %4828 = vmatpush3.bf16.msra.mxu0 %v5392_v6  ;;  %4783 = vmatprep.mubr.bf16.mxu0 %v6120_v28  ;;  %v2561_v54 = vmax.f32 %v2535_v47, 0.0  ;;  %v2538_v57 = vadd.f32 %v2537_v60, %v5780_v25  ;;  %v5395_v28 = vld [vmem:[%s6420_s2 + $0x1b8] sm:$0xff]  }
 0x1b6   : > { %4829 = vmatprep.subr.bf16.mxu0 %v5393_v17  ;;  %v2564_v58 = vmax.f32 %v2546_v53, 0.0 }
 0x1b7   : > { %v2562_v62 = vmax.f32 %v2538_v57, 0.0 }
 0x1b8   : > { %v6200_v32 = vpack.c.bf16 %v2564_v58, %v2563_v24 }
 0x1b9   : > { %4830 = vmatpush3.bf16.msra.mxu0 %v5393_v17  ;;  %v6202_v33 = vpack.c.bf16 %v2562_v62, %v2561_v54  ;;  %v4869_v63 = vpop.f32.mrb[96].mxu1 }
 0x1ba   : > { %4831 = vmatprep.subr.bf16.mxu0 %v5394_v52  ;;  %v2825_v2 = vadd.f32 %v4869_v63, %v5780_v25  ;;  %v2816_v39 = vpop.f32.mrb[97].mxu1  ;;  %v5402_v63 = vld [vmem:[%s6420_s2 + $0x1f0] sm:$0xff]  }
 0x1bb   : > { %v2817_v45 = vadd.f32 %v2816_v39, %v5780_v25  ;;  %v4870_v4 = vpop.f32.mrb[98].mxu1 }
 0x1bc   : > { %4784 = vmatmul.mubr.bf16.gmra.mrb[28].mxu0 %v6118_v48  ;;  %v2881_v7 = vmax.f32 %v2825_v2, 0.0  ;;  %v2828_v12 = vadd.f32 %v4870_v4, %v5780_v25  ;;  %v2819_v29 = vpop.f32.mrb[99].mxu1 }
 0x1bd   : > { %4832 = vmatpush3.bf16.msra.mxu0 %v5394_v52  ;;  %4835 = vmatprep.mubr.bf16.mxu0 %v6145_v42  ;;  %v2879_v13 = vmax.f32 %v2817_v45, 0.0  ;;  %v2820_v15 = vadd.f32 %v2819_v29, %v5780_v25  ;;  %v5397_v42 = vld [vmem:[%s6420_s2 + $0x1c8] sm:$0xff]  }
 0x1be   : > { %4833 = vmatprep.subr.bf16.mxu0 %v5395_v28  ;;  %v2882_v16 = vmax.f32 %v2828_v12, 0.0 }
 0x1bf   : > { %v2880_v3 = vmax.f32 %v2820_v15, 0.0 }
 0x1c0   : > { %v6216_v51 = vpack.c.bf16 %v2882_v16, %v2881_v7 }
 0x1c1   : > { %4834 = vmatpush3.bf16.msra.mxu0 %v5395_v28  ;;  %v6218_v48 = vpack.c.bf16 %v2880_v3, %v2879_v13  ;;  %v4873_v5 = vpop.f32.mrb[100].mxu1 }
 0x1c2   : > { %4883 = vmatprep.subr.bf16.mxu0 %v5396_v56  ;;  %v2841_v18 = vadd.f32 %v4873_v5, %v5780_v25  ;;  %v2832_v55 = vpop.f32.mrb[101].mxu1  ;;  %v5404_v5 = vld [vmem:[%s6420_s2 + $0x200] sm:$0xff]  }
 0x1c3   : > { %v2833_v19 = vadd.f32 %v2832_v55, %v5780_v25  ;;  %v4874_v9 = vpop.f32.mrb[102].mxu1 }
 0x1c4   : > { %4836 = vmatmul.mubr.bf16.vlgmr.msra.gmra.mrb[16].mxu0 %v6140_v10  ;;  %v2885_v1 = vmax.f32 %v2841_v18, 0.0  ;;  %v2844_v20 = vadd.f32 %v4874_v9, %v5780_v25  ;;  %v2835_v22 = vpop.f32.mrb[103].mxu1 }
 0x1c5   : > { %4884 = vmatpush3.bf16.msra.mxu0 %v5396_v56  ;;  %4839 = vmatprep.mubr.bf16.mxu0 %v6167_v59  ;;  %v2883_v23 = vmax.f32 %v2833_v19, 0.0  ;;  %v2836_v26 = vadd.f32 %v2835_v22, %v5780_v25  ;;  %v5399_v59 = vld [vmem:[%s6420_s2 + $0x1d8] sm:$0xff]  }
 0x1c6   : > { %4885 = vmatprep.subr.bf16.mxu0 %v5397_v42  ;;  %v2886_v50 = vmax.f32 %v2844_v20, 0.0 }
 0x1c7   : > { %v2884_v30 = vmax.f32 %v2836_v26, 0.0 }
 0x1c8   : > { %v6232_v11 = vpack.c.bf16 %v2886_v50, %v2885_v1 }
 0x1c9   : > { %4886 = vmatpush3.bf16.msra.mxu0 %v5397_v42  ;;  %v6234_v10 = vpack.c.bf16 %v2884_v30, %v2883_v23  ;;  %v4877_v31 = vpop.f32.mrb[104].mxu1 }
 0x1ca   : > { %4887 = vmatprep.subr.bf16.mxu0 %v5398_v27  ;;  %v2857_v35 = vadd.f32 %v4877_v31, %v5780_v25  ;;  %v2848_v14 = vpop.f32.mrb[105].mxu1  ;;  %v5406_v31 = vld [vmem:[%s6420_s2 + $0x210] sm:$0xff]  }
 0x1cb   : > { %v2849_v36 = vadd.f32 %v2848_v14, %v5780_v25  ;;  %v4878_v37 = vpop.f32.mrb[106].mxu1 }
 0x1cc   : > { %4840 = vmatmul.mubr.bf16.gmra.mrb[20].mxu0 %v6162_v0  ;;  %v2889_v38 = vmax.f32 %v2857_v35, 0.0  ;;  %v2860_v40 = vadd.f32 %v4878_v37, %v5780_v25  ;;  %v2851_v6 = vpop.f32.mrb[107].mxu1  ;;  %v5407_v37 = vld [vmem:[%s6420_s2 + $0x218] sm:$0xff]  }
 0x1cd   : > { %4888 = vmatpush3.bf16.msra.mxu0 %v5398_v27  ;;  %4843 = vmatprep.mubr.bf16.mxu0 %v6186_v61  ;;  %v2887_v34 = vmax.f32 %v2849_v36, 0.0  ;;  %v2852_v41 = vadd.f32 %v2851_v6, %v5780_v25  ;;  %v5401_v61 = vld [vmem:[%s6420_s2 + $0x1e8] sm:$0xff]  }
 0x1ce   : > { %4889 = vmatprep.subr.bf16.mxu0 %v5399_v59  ;;  %v2890_v17 = vmax.f32 %v2860_v40, 0.0 }
 0x1cf   : > { %v2888_v46 = vmax.f32 %v2852_v41, 0.0 }
 0x1d0   : > { %v6248_v21 = vpack.c.bf16 %v2890_v17, %v2889_v38 }
 0x1d1   : > { %4890 = vmatpush3.bf16.msra.mxu0 %v5399_v59  ;;  %v6250_v0 = vpack.c.bf16 %v2888_v46, %v2887_v34  ;;  %v4881_v47 = vpop.f32.mrb[108].mxu1 }
 0x1d2   : > { %4891 = vmatprep.subr.bf16.mxu0 %v5400_v44  ;;  %v2873_v49 = vadd.f32 %v4881_v47, %v5780_v25  ;;  %v2864_v24 = vpop.f32.mrb[109].mxu1  ;;  %v5408_v47 = vld [vmem:[%s6420_s2 + $0x220] sm:$0xff]  }
 0x1d3   : > { %v2865_v53 = vadd.f32 %v2864_v24, %v5780_v25  ;;  %v4882_v60 = vpop.f32.mrb[110].mxu1 }
 0x1d4   : > { %4844 = vmatmul.mubr.bf16.gmra.mrb[24].mxu0 %v6184_v43  ;;  %v2893_v54 = vmax.f32 %v2873_v49, 0.0  ;;  %v2876_v57 = vadd.f32 %v4882_v60, %v5780_v25  ;;  %v2867_v52 = vpop.f32.mrb[111].mxu1  ;;  %v5409_v60 = vld [vmem:[%s6420_s2 + $0x228] sm:$0xff]  }
 0x1d5   : > { %4892 = vmatpush3.bf16.msra.mxu0 %v5400_v44  ;;  %4847 = vmatprep.mubr.bf16.mxu0 %v6202_v33  ;;  %v2891_v58 = vmax.f32 %v2865_v53, 0.0  ;;  %v2868_v62 = vadd.f32 %v2867_v52, %v5780_v25  ;;  %v5403_v33 = vld [vmem:[%s6420_s2 + $0x1f8] sm:$0xff]  }
 0x1d6   : > { %4893 = vmatprep.subr.bf16.mxu0 %v5401_v61  ;;  %v2894_v28 = vmax.f32 %v2876_v57, 0.0 }
 0x1d7   : > { %v2892_v2 = vmax.f32 %v2868_v62, 0.0 }
 0x1d8   : > { %v6264_v39 = vpack.c.bf16 %v2894_v28, %v2893_v54 }
 0x1d9   : > { %4894 = vmatpush3.bf16.msra.mxu0 %v5401_v61  ;;  %v6266_v43 = vpack.c.bf16 %v2892_v2, %v2891_v58  ;;  %v4933_v45 = vpop.f32.mrb[112].mxu1 }
 0x1da   : > { %4895 = vmatprep.subr.bf16.mxu0 %v5402_v63  ;;  %v3171_v4 = vadd.f32 %v4933_v45, %v5780_v25  ;;  %v3162_v7 = vpop.f32.mrb[113].mxu1  ;;  %v5410_v45 = vld [vmem:[%s6420_s2 + $0x230] sm:$0xff]  }
 0x1db   : > { %v3163_v12 = vadd.f32 %v3162_v7, %v5780_v25  ;;  %v4934_v29 = vpop.f32.mrb[114].mxu1 }
 0x1dc   : > { %4848 = vmatmul.mubr.bf16.gmra.mrb[28].mxu0 %v6200_v32  ;;  %v3227_v13 = vmax.f32 %v3171_v4, 0.0  ;;  %v3174_v15 = vadd.f32 %v4934_v29, %v5780_v25  ;;  %v3165_v56 = vpop.f32.mrb[115].mxu1  ;;  %v3428_v29 = vsub.s32 1, %v5766_v8 }
 0x1dd   : > { %4896 = vmatpush3.bf16.msra.mxu0 %v5402_v63  ;;  %4899 = vmatprep.mubr.bf16.mxu0 %v6218_v48  ;;  %v3225_v16 = vmax.f32 %v3163_v12, 0.0  ;;  %v3166_v3 = vadd.f32 %v3165_v56, %v5780_v25  ;;  %v5405_v48 = vld [vmem:[%s6420_s2 + $0x208] sm:$0xff]   ;;  %v5411_v12 = vld [vmem:[%s6420_s2 + $0x238] sm:$0xff]  }
 0x1de   : > { %4897 = vmatprep.subr.bf16.mxu0 %v5403_v33  ;;  %v3228_v42 = vmax.f32 %v3174_v15, 0.0 }
 0x1df   : > { %v3226_v18 = vmax.f32 %v3166_v3, 0.0 }
 0x1e0   : > { %v6280_v55 = vpack.c.bf16 %v3228_v42, %v3227_v13  ;;  %v6339_v13 = vld [vmem:[%s6423_s5] sm:$0xff] }
 0x1e1   : > { %4898 = vmatpush3.bf16.msra.mxu0 %v5403_v33  ;;  %v6282_v32 = vpack.c.bf16 %v3226_v18, %v3225_v16  ;;  %v4937_v19 = vpop.f32.mrb[116].mxu1  ;;  %v6342_v15 = vrot.slane %v6339_v13, %v3428_v29 }
 0x1e2   : > { %4947 = vmatprep.subr.bf16.mxu0 %v5404_v5  ;;  %v3187_v9 = vadd.f32 %v4937_v19, %v5780_v25  ;;  %v3178_v1 = vpop.f32.mrb[117].mxu1 }
 0x1e3   : > { %v3179_v20 = vadd.f32 %v3178_v1, %v5780_v25  ;;  %v4938_v22 = vpop.f32.mrb[118].mxu1 }
 0x1e4   : > { %4900 = vmatmul.mubr.bf16.vlgmr.msra.gmra.mrb[16].mxu0 %v6216_v51  ;;  %v3231_v23 = vmax.f32 %v3187_v9, 0.0  ;;  %v3190_v26 = vadd.f32 %v4938_v22, %v5780_v25  ;;  %v3181_v27 = vpop.f32.mrb[119].mxu1 }
 0x1e5   : > { %4948 = vmatpush3.bf16.msra.mxu0 %v5404_v5  ;;  %4903 = vmatprep.mubr.bf16.mxu0 %v6234_v10  ;;  %v3229_v50 = vmax.f32 %v3179_v20, 0.0  ;;  %v3182_v30 = vadd.f32 %v3181_v27, %v5780_v25 }
 0x1e6   : > { %4949 = vmatprep.subr.bf16.mxu0 %v5405_v48  ;;  %v3232_v59 = vmax.f32 %v3190_v26, 0.0 }
 0x1e7   : > { %v3230_v35 = vmax.f32 %v3182_v30, 0.0 }
 0x1e8   : > { %v3244_v14 = vpack.c.bf16 %v3232_v59, %v3231_v23 }
 0x1e9   : > { %4950 = vmatpush3.bf16.msra.mxu0 %v5405_v48  ;;  %v3243_v51 = vpack.c.bf16 %v3230_v35, %v3229_v50  ;;  %v4941_v36 = vpop.f32.mrb[120].mxu1  ;;  %v5421_v50 = vld [vmem:[%s6422_s4 + $0x8] sm:$0xff]  }
 0x1ea   : > { %4951 = vmatprep.subr.bf16.mxu0 %v5406_v31  ;;  %v3203_v10 = vadd.f32 %v4941_v36, %v5780_v25  ;;  %v3194_v38 = vpop.f32.mrb[121].mxu1 }
 0x1eb   : > { %v3195_v40 = vadd.f32 %v3194_v38, %v5780_v25  ;;  %v4942_v6 = vpop.f32.mrb[122].mxu1 }
 0x1ec   : > { %4904 = vmatmul.mubr.bf16.gmra.mrb[20].mxu0 %v6232_v11  ;;  %v3235_v34 = vmax.f32 %v3203_v10, 0.0  ;;  %v3206_v41 = vadd.f32 %v4942_v6, %v5780_v25  ;;  %v3197_v44 = vpop.f32.mrb[123].mxu1 }
 0x1ed   : > { %4952 = vmatpush3.bf16.msra.mxu0 %v5406_v31  ;;  %4907 = vmatprep.mubr.bf16.mxu0 %v6250_v0  ;;  %v3233_v17 = vmax.f32 %v3195_v40, 0.0  ;;  %v3198_v46 = vadd.f32 %v3197_v44, %v5780_v25 }
 0x1ee   : > { %4953 = vmatprep.subr.bf16.mxu0 %v5407_v37  ;;  %v3236_v61 = vmax.f32 %v3206_v41, 0.0 }
 0x1ef   : > { %v3234_v49 = vmax.f32 %v3198_v46, 0.0 }
 0x1f0   : > { %v3246_v24 = vpack.c.bf16 %v3236_v61, %v3235_v34 }
 0x1f1   : > { %4954 = vmatpush3.bf16.msra.mxu0 %v5407_v37  ;;  %v3245_v11 = vpack.c.bf16 %v3234_v49, %v3233_v17  ;;  %v4945_v53 = vpop.f32.mrb[124].mxu1  ;;  %v5422_v37 = vld [vmem:[%s6422_s4 + $0x10] sm:$0xff]   ;;  %v5423_v17 = vld [vmem:[%s6422_s4 + $0x18] sm:$0xff]  }
 0x1f2   : > { %4955 = vmatprep.subr.bf16.mxu0 %v5408_v47  ;;  %v3219_v0 = vadd.f32 %v4945_v53, %v5780_v25  ;;  %v3210_v54 = vpop.f32.mrb[125].mxu1 }
 0x1f3   : > { %v3211_v57 = vadd.f32 %v3210_v54, %v5780_v25  ;;  %v4946_v52 = vpop.f32.mrb[126].mxu1 }
 0x1f4   : > { %4908 = vmatmul.mubr.bf16.gmra.mrb[24].mxu0 %v6248_v21  ;;  %v3239_v58 = vmax.f32 %v3219_v0, 0.0  ;;  %v3222_v62 = vadd.f32 %v4946_v52, %v5780_v25  ;;  %v3213_v63 = vpop.f32.mrb[127].mxu1 }
 0x1f5   : > { %4956 = vmatpush3.bf16.msra.mxu0 %v5408_v47  ;;  %4911 = vmatprep.mubr.bf16.mxu0 %v6266_v43  ;;  %v3237_v28 = vmax.f32 %v3211_v57, 0.0  ;;  %v3214_v2 = vadd.f32 %v3213_v63, %v5780_v25  ;;  %v5418_v25 = vld [vmem:[%s6421_s3 + $0x30] sm:$0xff]   ;;  %v5420_v43 = vld [vmem:[%s6422_s4] sm:$0xff]  }
 0x1f6   : > { %4957 = vmatprep.subr.bf16.mxu0 %v5409_v60  ;;  %v3240_v33 = vmax.f32 %v3222_v62, 0.0  ;;  %4991 = vmatprep.subr.bf16.mxu1 %v5418_v25 }
 0x1f7   : > { %v3238_v4 = vmax.f32 %v3214_v2, 0.0  ;;  %4992 = vmatpush3.bf16.msra.mxu1 %v5418_v25  ;;  %v5426_v25 = vld [vmem:[%s6422_s4 + $0x30] sm:$0xff]  }
 0x1f8   : > { %v3248_v7 = vpack.c.bf16 %v3240_v33, %v3239_v58 }
 0x1f9   : > { %4958 = vmatpush3.bf16.msra.mxu0 %v5409_v60  ;;  %v3247_v21 = vpack.c.bf16 %v3238_v4, %v3237_v28  ;;  %v5424_v60 = vld [vmem:[%s6422_s4 + $0x20] sm:$0xff]   ;;  %v5425_v28 = vld [vmem:[%s6422_s4 + $0x28] sm:$0xff]  }
 0x1fa   : > { %4959 = vmatprep.subr.bf16.mxu0 %v5410_v45 }
 0x1fc   : > { %4912 = vmatmul.mubr.bf16.gmra.mrb[28].mxu0 %v6264_v39  ;;  %v5419_v39 = vld [vmem:[%s6421_s3 + $0x38] sm:$0xff]  }
 0x1fd   : > { %4960 = vmatpush3.bf16.msra.mxu0 %v5410_v45  ;;  %4963 = vmatprep.mubr.bf16.mxu0 %v6282_v32 }
 0x1fe   : > { %4961 = vmatprep.subr.bf16.mxu0 %v5411_v12  ;;  %4993 = vmatprep.subr.bf16.mxu1 %v5419_v39 }
 0x1ff   : > { %4994 = vmatpush3.bf16.msra.mxu1 %v5419_v39 }
 0x200   : > { %5011 = vmatprep.subr.bf16.mxu1 %v5420_v43 }
 0x201   : > { %4962 = vmatpush3.bf16.msra.mxu0 %v5411_v12 }
 0x204   : > { %4964 = vmatmul.mubr.bf16.vlgmr.msra.gmra.mrb[16].mxu0 %v6280_v55 }
 0x205   : > { %4967 = vmatprep.mubr.bf16.mxu0 %v3243_v51 }
 0x20c   : > { %4968 = vmatmul.mubr.bf16.gmra.mrb[20].mxu0 %v3244_v14 }
 0x20d   : > { %4971 = vmatprep.mubr.bf16.mxu0 %v3245_v11 }
 0x214   : > { %4972 = vmatmul.mubr.bf16.gmra.mrb[24].mxu0 %v3246_v24 }
 0x215   : > { %4975 = vmatprep.mubr.bf16.mxu0 %v3247_v21 }
 0x21c   : > { %4976 = vmatmul.mubr.bf16.gmra.mrb[28].mxu0 %v3248_v7 }
 0x2d7   : > { %v4965_v56 = vpop.f32.mrb[16].mxu0 }
 0x2d8   : > { %v3432_v16 = vadd.f32 %v4965_v56, %v6342_v15  ;;  %v3347_v3 = vpop.f32.mrb[17].mxu0 }
 0x2d9   : > { %v3430_v5 = vadd.f32 %v6342_v15, %v3347_v3  ;;  %v4966_v42 = vpop.f32.mrb[18].mxu0  ;;  %v5438_v3 = vld [vmem:[%s5529_s11 + $0x58] ss:$36 sps:$4 sm:$0xff]  }
 0x2da   : > { %v3433_v18 = vadd.f32 %v4966_v42, %v6342_v15  ;;  %v3350_v55 = vpop.f32.mrb[19].mxu0  ;;  %v3448_v19 = vmax.f32 %v3432_v16, 0.0  ;;  %v5437_v16 = vld [vmem:[%s5529_s11 + $0x10] ss:$36 sps:$4 sm:$0xff]   ;;  %v5440_v42 = vld [vmem:[%s5529_s11 + $0xe8] ss:$36 sps:$4 sm:$0xff]  }
 0x2db   : > { %v3431_v32 = vadd.f32 %v6342_v15, %v3350_v55  ;;  %v3446_v9 = vmax.f32 %v3430_v5, 0.0  ;;  %v5439_v5 = vld [vmem:[%s5529_s11 + $0xa0] ss:$36 sps:$4 sm:$0xff]   ;;  %v5442_v55 = vld [vmem:[%s5529_s11 + $0x178] ss:$36 sps:$4 sm:$0xff]  }
 0x2dc   : > { %v3449_v48 = vmax.f32 %v3433_v18, 0.0  ;;  %v5441_v18 = vld [vmem:[%s5529_s11 + $0x130] ss:$36 sps:$4 sm:$0xff]  }
 0x2dd   : > { %v3447_v1 = vmax.f32 %v3431_v32, 0.0  ;;  %v5443_v32 = vld [vmem:[%s5529_s11 + $0x1c0] ss:$36 sps:$4 sm:$0xff]  }
 0x2de   : > { %v3463_v20 = vpack.c.bf16 %v3449_v48, %v3448_v19  ;;  %v5444_v19 = vld [vmem:[%s5529_s11 + $0x208] ss:$36 sps:$4 sm:$0xff]   ;;  %v3488_v48 = vsub.s32 2, %v5766_v8 }
 0x2df   : > { %v3462_v22 = vpack.c.bf16 %v3447_v1, %v3446_v9  ;;  %v4969_v23 = vpop.f32.mrb[20].mxu0  ;;  %v3653_v9 = vsub.s32 3, %v5766_v8 }
 0x2e0   : > { %v3436_v26 = vadd.f32 %v4969_v23, %v6342_v15  ;;  %v3363_v27 = vpop.f32.mrb[21].mxu0  ;;  %v3489_v1 = vrot.slane %v6339_v13, %v3488_v48 }
 0x2e1   : > { %v3434_v30 = vadd.f32 %v6342_v15, %v3363_v27  ;;  %v4970_v31 = vpop.f32.mrb[22].mxu0  ;;  %4995 = vmatprep.mubr.bf16.mxu1 %v3462_v22 }
 0x2e2   : > { %v3437_v59 = vadd.f32 %v4970_v31, %v6342_v15  ;;  %v3366_v35 = vpop.f32.mrb[23].mxu0  ;;  %4996 = vmatmul.mubr.bf16.vlgmr.msra.gmra.mrb[128].mxu1 %v3463_v20  ;;  %v3452_v51 = vmax.f32 %v3436_v26, 0.0  ;;  %v3654_v20 = vrot.slane %v6339_v13, %v3653_v9 }
 0x2e3   : > { %v3435_v14 = vadd.f32 %v6342_v15, %v3366_v35  ;;  %5012 = vmatpush3.bf16.msra.mxu1 %v5420_v43  ;;  %v3450_v10 = vmax.f32 %v3434_v30, 0.0 }
 0x2e4   : > { %v3453_v36 = vmax.f32 %v3437_v59, 0.0  ;;  %5013 = vmatprep.subr.bf16.mxu1 %v5421_v50  ;;  %v5045_v22 = vadd.f32 %v3654_v20, %v3489_v1 }
 0x2e5   : > { %v3451_v38 = vmax.f32 %v3435_v14, 0.0 }
 0x2e6   : > { %v3465_v40 = vpack.c.bf16 %v3453_v36, %v3452_v51 }
 0x2e7   : > { %v3464_v6 = vpack.c.bf16 %v3451_v38, %v3450_v10  ;;  %5014 = vmatpush3.bf16.msra.mxu1 %v5421_v50  ;;  %v4973_v34 = vpop.f32.mrb[24].mxu0 }
 0x2e8   : > { %v3440_v41 = vadd.f32 %v4973_v34, %v6342_v15  ;;  %v3379_v44 = vpop.f32.mrb[25].mxu0  ;;  %5015 = vmatprep.subr.bf16.mxu1 %v5422_v37 }
 0x2e9   : > { %v3438_v46 = vadd.f32 %v6342_v15, %v3379_v44  ;;  %v4974_v47 = vpop.f32.mrb[26].mxu0  ;;  %4999 = vmatprep.mubr.bf16.mxu1 %v3464_v6 }
 0x2ea   : > { %v3441_v61 = vadd.f32 %v4974_v47, %v6342_v15  ;;  %v3382_v49 = vpop.f32.mrb[27].mxu0  ;;  %5000 = vmatmul.mubr.bf16.gmra.mrb[132].mxu1 %v3465_v40  ;;  %v3456_v11 = vmax.f32 %v3440_v41, 0.0 }
 0x2eb   : > { %v3439_v24 = vadd.f32 %v6342_v15, %v3382_v49  ;;  %5016 = vmatpush3.bf16.msra.mxu1 %v5422_v37  ;;  %v3454_v0 = vmax.f32 %v3438_v46, 0.0 }
 0x2ec   : > { %v3457_v53 = vmax.f32 %v3441_v61, 0.0  ;;  %5017 = vmatprep.subr.bf16.mxu1 %v5423_v17 }
 0x2ed   : > { %v3455_v54 = vmax.f32 %v3439_v24, 0.0 }
 0x2ee   : > { %v3467_v57 = vpack.c.bf16 %v3457_v53, %v3456_v11 }
 0x2ef   : > { %v3466_v52 = vpack.c.bf16 %v3455_v54, %v3454_v0  ;;  %5018 = vmatpush3.bf16.msra.mxu1 %v5423_v17  ;;  %v4977_v58 = vpop.f32.mrb[28].mxu0 }
 0x2f0   : > { %v3444_v62 = vadd.f32 %v4977_v58, %v6342_v15  ;;  %v3395_v63 = vpop.f32.mrb[29].mxu0  ;;  %5019 = vmatprep.subr.bf16.mxu1 %v5424_v60 }
 0x2f1   : > { %v3442_v2 = vadd.f32 %v6342_v15, %v3395_v63  ;;  %v4978_v45 = vpop.f32.mrb[30].mxu0  ;;  %5003 = vmatprep.mubr.bf16.mxu1 %v3466_v52 }
 0x2f2   : > { %v3445_v33 = vadd.f32 %v4978_v45, %v6342_v15  ;;  %v3398_v4 = vpop.f32.mrb[31].mxu0  ;;  %5004 = vmatmul.mubr.bf16.gmra.mrb[136].mxu1 %v3467_v57  ;;  %v3460_v21 = vmax.f32 %v3444_v62, 0.0 }
 0x2f3   : > { %v3443_v7 = vadd.f32 %v6342_v15, %v3398_v4  ;;  %5020 = vmatpush3.bf16.msra.mxu1 %v5424_v60  ;;  %v3458_v39 = vmax.f32 %v3442_v2, 0.0  ;;  %v5427_v15 = vld [vmem:[%s6422_s4 + $0x38] sm:$0xff]  }
 0x2f4   : > { %v3461_v12 = vmax.f32 %v3445_v33, 0.0  ;;  %5021 = vmatprep.subr.bf16.mxu1 %v5425_v28 }
 0x2f5   : > { %v3459_v43 = vmax.f32 %v3443_v7, 0.0 }
 0x2f6   : > { %v3469_v29 = vpack.c.bf16 %v3461_v12, %v3460_v21 }
 0x2f7   : > { %v3468_v56 = vpack.c.bf16 %v3459_v43, %v3458_v39  ;;  %5022 = vmatpush3.bf16.msra.mxu1 %v5425_v28 }
 0x2f8   : > { %5023 = vmatprep.subr.bf16.mxu1 %v5426_v25 }
 0x2f9   : > { %5007 = vmatprep.mubr.bf16.mxu1 %v3468_v56 }
 0x2fa   : > { %5008 = vmatmul.mubr.bf16.gmra.mrb[140].mxu1 %v3469_v29 }
 0x2fb   : > { %5024 = vmatpush3.bf16.msra.mxu1 %v5426_v25  ;;  %5027 = vmatprep.mubr.bf16.mxu1 %v5437_v16 }
 0x2fc   : > { %5025 = vmatprep.subr.bf16.mxu1 %v5427_v15 }
 0x2ff   : > { %5026 = vmatpush3.bf16.msra.mxu1 %v5427_v15 }
 0x302   : > { %5028 = vmatmul.mubr.bf16.vlgmr.msra.gmra.mrb[128].mxu1 %v5438_v3 }
 0x303   : > { %5031 = vmatprep.mubr.bf16.mxu1 %v5439_v5 }
 0x30a   : > { %5032 = vmatmul.mubr.bf16.gmra.mrb[132].mxu1 %v5440_v42 }
 0x30b   : > { %5035 = vmatprep.mubr.bf16.mxu1 %v5441_v18 }
 0x312   : > { %5036 = vmatmul.mubr.bf16.gmra.mrb[136].mxu1 %v5442_v55 }
 0x313   : > { %5039 = vmatprep.mubr.bf16.mxu1 %v5443_v32 }
 0x31a   : > { %5040 = vmatmul.mubr.bf16.gmra.mrb[140].mxu1 %v5444_v19 }
 0x3d5   : > { %v5029_v23 = vpop.f32.mrb[128].mxu1 }
 0x3d6   : > { %v5044_v26 = vadd.f32 %v5045_v22, %v5029_v23  ;;  %v3737_v27 = vpop.f32.mrb[129].mxu1 }
 0x3d7   : > { %v5046_v50 = vadd.f32 %v5045_v22, %v3737_v27  ;;  %v5030_v8 = vpop.f32.mrb[130].mxu1 }
 0x3d8   : > { %v3818_v30 = vmax.f32 %v5044_v26, 0.0  ;;  %v5048_v31 = vadd.f32 %v5045_v22, %v5030_v8  ;;  %v3740_v59 = vpop.f32.mrb[131].mxu1 }
 0x3d9   : > { %v3816_v13 = vmax.f32 %v5046_v50, 0.0  ;;  %v5050_v35 = vadd.f32 %v5045_v22, %v3740_v59 }
 0x3da   : > { %3834 = vst [vmem:[%s6397_s8 + $0x10] sm:$0xff] %v3818_v30  ;;  %v3819_v14 = vmax.f32 %v5048_v31, 0.0 }
 0x3db   : > { %3832 = vst [vmem:[%s6397_s8] sm:$0xff] %v3816_v13  ;;  %v3817_v51 = vmax.f32 %v5050_v35, 0.0 }
 0x3dc   : > { %3835 = vst [vmem:[%s6397_s8 + $0x18] sm:$0xff] %v3819_v14 }
 0x3dd   : > { %3833 = vst [vmem:[%s6397_s8 + $0x8] sm:$0xff] %v3817_v51  ;;  %v5033_v36 = vpop.f32.mrb[132].mxu1 }
 0x3de   : > { %v5052_v37 = vadd.f32 %v5045_v22, %v5033_v36  ;;  %v3753_v10 = vpop.f32.mrb[133].mxu1 }
 0x3df   : > { %v5054_v38 = vadd.f32 %v5045_v22, %v3753_v10  ;;  %v5034_v40 = vpop.f32.mrb[134].mxu1 }
 0x3e0   : > { %v3822_v6 = vmax.f32 %v5052_v37, 0.0  ;;  %v5056_v34 = vadd.f32 %v5045_v22, %v5034_v40  ;;  %v3756_v41 = vpop.f32.mrb[135].mxu1 }
 0x3e1   : > { %v3820_v44 = vmax.f32 %v5054_v38, 0.0  ;;  %v5058_v17 = vadd.f32 %v5045_v22, %v3756_v41 }
 0x3e2   : > { %3838 = vst [vmem:[%s6397_s8 + $0x30] sm:$0xff] %v3822_v6  ;;  %v3823_v46 = vmax.f32 %v5056_v34, 0.0 }
 0x3e3   : > { %3836 = vst [vmem:[%s6397_s8 + $0x20] sm:$0xff] %v3820_v44  ;;  %v3821_v47 = vmax.f32 %v5058_v17, 0.0 }
 0x3e4   : > { %3839 = vst [vmem:[%s6397_s8 + $0x38] sm:$0xff] %v3823_v46 }
 0x3e5   : > { %3837 = vst [vmem:[%s6397_s8 + $0x28] sm:$0xff] %v3821_v47  ;;  %v5037_v61 = vpop.f32.mrb[136].mxu1 }
 0x3e6   : > { %v5060_v49 = vadd.f32 %v5045_v22, %v5037_v61  ;;  %v3769_v24 = vpop.f32.mrb[137].mxu1 }
 0x3e7   : > { %v5062_v11 = vadd.f32 %v5045_v22, %v3769_v24  ;;  %v5038_v53 = vpop.f32.mrb[138].mxu1 }
 0x3e8   : > { %v3826_v60 = vmax.f32 %v5060_v49, 0.0  ;;  %v5064_v0 = vadd.f32 %v5045_v22, %v5038_v53  ;;  %v3772_v54 = vpop.f32.mrb[139].mxu1 }
 0x3e9   : > { %v3824_v57 = vmax.f32 %v5062_v11, 0.0  ;;  %v5066_v52 = vadd.f32 %v5045_v22, %v3772_v54 }
 0x3ea   : > { %3842 = vst [vmem:[%s6397_s8 + $0x50] sm:$0xff] %v3826_v60  ;;  %v3827_v58 = vmax.f32 %v5064_v0, 0.0 }
 0x3eb   : > { %3840 = vst [vmem:[%s6397_s8 + $0x40] sm:$0xff] %v3824_v57  ;;  %v3825_v62 = vmax.f32 %v5066_v52, 0.0 }
 0x3ec   : > { %3843 = vst [vmem:[%s6397_s8 + $0x58] sm:$0xff] %v3827_v58 }
 0x3ed   : > { %3841 = vst [vmem:[%s6397_s8 + $0x48] sm:$0xff] %v3825_v62  ;;  %v5041_v63 = vpop.f32.mrb[140].mxu1 }
 0x3ee   : > { %v5068_v28 = vadd.f32 %v5045_v22, %v5041_v63  ;;  %v3785_v2 = vpop.f32.mrb[141].mxu1 }
 0x3ef   : > { %v5070_v45 = vadd.f32 %v5045_v22, %v3785_v2  ;;  %v5042_v33 = vpop.f32.mrb[142].mxu1 }
 0x3f0   : > { %v3830_v4 = vmax.f32 %v5068_v28, 0.0  ;;  %v5072_v7 = vadd.f32 %v5045_v22, %v5042_v33  ;;  %v3788_v21 = vpop.f32.mrb[143].mxu1 }
 0x3f1   : > { %v3828_v12 = vmax.f32 %v5070_v45, 0.0  ;;  %v5074_v25 = vadd.f32 %v5045_v22, %v3788_v21 }
 0x3f2   : > { %3846 = vst [vmem:[%s6397_s8 + $0x70] sm:$0xff] %v3830_v4  ;;  %v3831_v39 = vmax.f32 %v5072_v7, 0.0 }
 0x3f3   : > { %3844 = vst [vmem:[%s6397_s8 + $0x60] sm:$0xff] %v3828_v12  ;;  %v3829_v43 = vmax.f32 %v5074_v25, 0.0 }
 0x3f4   : > { %3847 = vst [vmem:[%s6397_s8 + $0x78] sm:$0xff] %v3831_v39 }
 0x3f5   : > { %3845 = vst [vmem:[%s6397_s8 + $0x68] sm:$0xff] %v3829_v43 }
 0x3f6 PF: > { %s16_s21 = sadd.s32 1, %s5451_s21  }
 0x3f7   : > { %p13_p4 = scmp.ge.s32.totalorder %s16_s21, 6  }
 0x3f9   :  { %15 = sbr.rel (!%p13_p4) target bundleno = 1 (0x1), region = 74 }

</bundles_post_ra>
